<compile_context>
chip_gen: v5e
topology: v5e:2x2
jax: 0.10.0
libtpu: 0.0.40
codegen_flags: <defaults>
</compile_context>

<pallas_src>
import functools

import jax
import jax.numpy as jnp
from jax.experimental import pallas as pl
from jax.experimental.pallas import tpu as pltpu


def _autoencoder_kernel(x_ref, w1e_ref, b1e_ref, w2e_ref, b2e_ref,
                        w1d_ref, b1d_ref, w2d_ref, b2d_ref,
                        enc_ref, dec_ref):
    """Batch-major tiles: x (TB, F); enc (TB, L); dec (TB, F).

    Weights are stored (in, out) so every matmul is a plain `x @ W` (MXU
    f32 accumulation); compute is fully hidden behind the x/enc/dec DMAs.
    Rows (batch elements) never mix -- contractions are over features only --
    so undefined rows in a ragged last tile are harmless and dropped by the
    bounded output writeback.
    """
    x = x_ref[...]                                                        # (TB, F)

    # ---------------- encoder:  F -> F//2 -> L ----------------
    h = jnp.dot(x, w1e_ref[...], preferred_element_type=jnp.float32)     # (TB, H)
    h = jnp.tanh(h + b1e_ref[...])
    enc = jnp.dot(h, w2e_ref[...], preferred_element_type=jnp.float32)   # (TB, L)
    enc = enc + b2e_ref[...]
    enc_ref[...] = enc.astype(enc_ref.dtype)

    # ---------------- decoder:  L -> F//2 -> F ----------------
    h2 = jnp.dot(enc, w1d_ref[...], preferred_element_type=jnp.float32)  # (TB, H)
    h2 = jnp.tanh(h2 + b1d_ref[...])
    dec = jnp.dot(h2, w2d_ref[...], preferred_element_type=jnp.float32)  # (TB, F)
    dec_ref[...] = (dec + b2d_ref[...]).astype(dec_ref.dtype)


def _xavier_normal_t(key, in_f, out_f):
    # torch.nn.init.xavier_normal_ (gain=1): std = sqrt(2 / (fan_in + fan_out)).
    # Drawn directly in (in, out) layout so the kernel never transposes weights.
    std = (2.0 / (in_f + out_f)) ** 0.5
    return std * jax.random.normal(key, (in_f, out_f), dtype=jnp.float32)


def init_autoencoder_params(key, input_size, latent_size):
    """Weights stored (in, out); biases stored as (1, out) rows (sublane bcast).
    Biases are zero, exactly matching nn.init.zeros_ in the reference module."""
    hidden = input_size // 2
    k1, k2, k3, k4 = jax.random.split(key, 4)
    w1e = _xavier_normal_t(k1, input_size, hidden)      # enc.fc1.weight^T
    w2e = _xavier_normal_t(k2, hidden, latent_size)     # enc.fc2.weight^T
    w1d = _xavier_normal_t(k3, latent_size, hidden)     # dec.fc1.weight^T
    w2d = _xavier_normal_t(k4, hidden, input_size)      # dec.fc2.weight^T
    b1e = jnp.zeros((1, hidden), jnp.float32)
    b2e = jnp.zeros((1, latent_size), jnp.float32)
    b1d = jnp.zeros((1, hidden), jnp.float32)
    b2d = jnp.zeros((1, input_size), jnp.float32)
    return (w1e, b1e, w2e, b2e, w1d, b1d, w2d, b2d)


def _pick_tile_b(batch, target, min_steps=2):
    """Largest batch tile <= target that (a) keeps >= min_steps grid steps so
    v7x's two TensorCores both get work, and (b) is a sublane multiple of 8
    (or equals the full batch when batch is tiny)."""
    if batch <= 8:
        return batch
    tb = max(8, min(target, -(-batch // min_steps)))
    tb = -(-tb // 8) * 8
    return min(tb, batch)


@functools.partial(jax.jit, static_argnames=("tile_b",))
def autoencoder_forward(x, params, *, tile_b=4096):
    """x: (B, input_size) batch-major (PyTorch convention).
    Returns (encoded (B, latent), decoded (B, input_size)), both float32."""
    w1e, b1e, w2e, b2e, w1d, b1d, w2d, b2d = params
    x = jnp.asarray(x, jnp.float32)                 # matches `x.float()` in the module
    B, F = x.shape
    H = w1e.shape[1]
    L = w2e.shape[1]

    tb = _pick_tile_b(B, tile_b)
    n_tiles = pl.cdiv(B, tb)

    # Weights / biases: constant index_map -> fetched once, VMEM-resident.
    pinned = lambda a: pl.BlockSpec(a.shape, lambda i: (0, 0))

    cost = pl.CostEstimate(
        flops=2 * B * (F * H + H * L + L * H + H * F),
        transcendentals=2 * B * H,
        bytes_accessed=4 * (2 * B * F + B * L)                       # x in, dec/enc out
                       + 4 * (F * H + H * L + L * H + H * F          # weights
                              + 2 * H + L + F),                      # biases
    )

    encoded, decoded = pl.pallas_call(
        _autoencoder_kernel,
        out_shape=(jax.ShapeDtypeStruct((B, L), jnp.float32),
                   jax.ShapeDtypeStruct((B, F), jnp.float32)),
        grid=(n_tiles,),
        in_specs=[
            # x stream: batch-tiled, default double-buffered.
            pl.BlockSpec((tb, F), lambda i: (i, 0)),
            pinned(w1e), pinned(b1e), pinned(w2e), pinned(b2e),
            pinned(w1d), pinned(b1d), pinned(w2d), pinned(b2d),
        ],
        out_specs=(pl.BlockSpec((tb, L), lambda i: (i, 0)),
                   pl.BlockSpec((tb, F), lambda i: (i, 0))),
        compiler_params=pltpu.CompilerParams(
            dimension_semantics=("parallel",)),      # v7x: shard batch grid over 2 TCs
        cost_estimate=cost,
    )(x, w1e, b1e, w2e, b2e, w1d, b1d, w2d, b2d)

    return encoded, decoded


def _reference(x, params):
    """Plain-JAX replica of the PyTorch forward (batch-major, (in,out) weights)."""
    w1e, b1e, w2e, b2e, w1d, b1d, w2d, b2d = params
    xf = x.astype(jnp.float32)
    h = jnp.tanh(xf @ w1e + b1e)
    enc = h @ w2e + b2e
    h2 = jnp.tanh(enc @ w1d + b1d)
    dec = h2 @ w2d + b2d
    return enc, dec


if __name__ == "__main__":
    input_size = 32
    latent_size = 8

    key = jax.random.PRNGKey(0)
    k_params, k_x1, k_x2 = jax.random.split(key, 3)
    params = init_autoencoder_params(k_params, input_size, latent_size)

    # Main test: B=1024 -> auto-picked tile 512, 2 grid steps (exercises the
    # pipelined batch grid and megacore sharding on v7x).
    x = jax.random.normal(k_x1, (1024, input_size), dtype=jnp.float32)
    enc, dec = autoencoder_forward(x, params)
    jax.block_until_ready((enc, dec))

    ref_enc, ref_dec = _reference(x, params)
    assert enc.shape == (1024, latent_size)
    assert dec.shape == (1024, input_size)
    assert jnp.allclose(enc, ref_enc, atol=1e-4, rtol=1e-4)
    assert jnp.allclose(dec, ref_dec, atol=1e-4, rtol=1e-4)

    # Small batch: single full-extent block (tile == B) path.
    x_small = jax.random.normal(k_x2, (8, input_size), dtype=jnp.float32)
    enc_s, dec_s = autoencoder_forward(x_small, params)
    jax.block_until_ready((enc_s, dec_s))
    ref_enc_s, ref_dec_s = _reference(x_small, params)
    assert jnp.allclose(enc_s, ref_enc_s, atol=1e-4, rtol=1e-4)
    assert jnp.allclose(dec_s, ref_dec_s, atol=1e-4, rtol=1e-4)

    # Ragged batch (not a tile multiple): no pad/slice; relies on Pallas
    # edge-block handling (rows independent, tail rows dropped at writeback).
    x_rag = jax.random.normal(k_x2, (1000, input_size), dtype=jnp.float32)
    enc_r, dec_r = autoencoder_forward(x_rag, params)
    jax.block_until_ready((enc_r, dec_r))
    ref_enc_r, ref_dec_r = _reference(x_rag, params)
    assert jnp.allclose(enc_r, ref_enc_r, atol=1e-4, rtol=1e-4)
    assert jnp.allclose(dec_r, ref_dec_r, atol=1e-4, rtol=1e-4)

    print("KERNEL_OK")
</pallas_src>

<mosaic_0001>
module attributes {stable_mosaic.version = 11 : i64} {
  func.func @_autoencoder_kernel(%arg0: i32, %arg1: memref<512x32xf32, #tpu.memory_space<vmem>>, %arg2: memref<32x16xf32, #tpu.memory_space<vmem>>, %arg3: memref<1x16xf32, #tpu.memory_space<vmem>>, %arg4: memref<16x8xf32, #tpu.memory_space<vmem>>, %arg5: memref<1x8xf32, #tpu.memory_space<vmem>>, %arg6: memref<8x16xf32, #tpu.memory_space<vmem>>, %arg7: memref<1x16xf32, #tpu.memory_space<vmem>>, %arg8: memref<16x32xf32, #tpu.memory_space<vmem>>, %arg9: memref<1x32xf32, #tpu.memory_space<vmem>>, %arg10: memref<512x8xf32, #tpu.memory_space<vmem>>, %arg11: memref<512x32xf32, #tpu.memory_space<vmem>>) attributes {dimension_semantics = [#tpu.dimension_semantics<parallel>], iteration_bounds = array<i64: 2>, scalar_prefetch = 0 : i64, scratch_operands = 0 : i64, tpu.core_type = #tpu.core_type<tc>, window_params = [{transform_indices = @transform_0, window_bounds = array<i64: 512, 32>}, {pipeline_mode = #tpu.pipeline_mode<synchronous>, transform_indices = @transform_1, window_bounds = array<i64: 32, 16>}, {pipeline_mode = #tpu.pipeline_mode<synchronous>, transform_indices = @transform_2, window_bounds = array<i64: 1, 16>}, {pipeline_mode = #tpu.pipeline_mode<synchronous>, transform_indices = @transform_3, window_bounds = array<i64: 16, 8>}, {pipeline_mode = #tpu.pipeline_mode<synchronous>, transform_indices = @transform_4, window_bounds = array<i64: 1, 8>}, {pipeline_mode = #tpu.pipeline_mode<synchronous>, transform_indices = @transform_5, window_bounds = array<i64: 8, 16>}, {pipeline_mode = #tpu.pipeline_mode<synchronous>, transform_indices = @transform_6, window_bounds = array<i64: 1, 16>}, {pipeline_mode = #tpu.pipeline_mode<synchronous>, transform_indices = @transform_7, window_bounds = array<i64: 16, 32>}, {pipeline_mode = #tpu.pipeline_mode<synchronous>, transform_indices = @transform_8, window_bounds = array<i64: 1, 32>}, {transform_indices = @transform_9, window_bounds = array<i64: 512, 8>}, {transform_indices = @transform_10, window_bounds = array<i64: 512, 32>}]} {
    %c0 = arith.constant 0 : index
    %c0_0 = arith.constant 0 : index
    %0 = vector.load %arg1[%c0, %c0_0] : memref<512x32xf32, #tpu.memory_space<vmem>>, vector<512x32xf32>
    %c0_1 = arith.constant 0 : index
    %c0_2 = arith.constant 0 : index
    %1 = vector.load %arg2[%c0_1, %c0_2] : memref<32x16xf32, #tpu.memory_space<vmem>>, vector<32x16xf32>
    %cst = arith.constant dense<0.000000e+00> : vector<512x16xf32>
    %2 = tpu.matmul %0, %1, %cst {dimension_numbers = #tpu.dot_dimension_numbers<[1], [0], [0], [1], [0, 0, 1, 1], [], []>} : vector<512x32xf32>, vector<32x16xf32>, vector<512x16xf32> -> vector<512x16xf32>
    %c0_3 = arith.constant 0 : index
    %c0_4 = arith.constant 0 : index
    %3 = vector.load %arg3[%c0_3, %c0_4] : memref<1x16xf32, #tpu.memory_space<vmem>>, vector<1x16xf32>
    %4 = vector.broadcast %3 : vector<1x16xf32> to vector<512x16xf32>
    %5 = arith.addf %2, %4 : vector<512x16xf32>
    %6 = math.tanh %5 : vector<512x16xf32>
    %c0_5 = arith.constant 0 : index
    %c0_6 = arith.constant 0 : index
    %7 = vector.load %arg4[%c0_5, %c0_6] : memref<16x8xf32, #tpu.memory_space<vmem>>, vector<16x8xf32>
    %cst_7 = arith.constant dense<0.000000e+00> : vector<512x8xf32>
    %8 = tpu.matmul %6, %7, %cst_7 {dimension_numbers = #tpu.dot_dimension_numbers<[1], [0], [0], [1], [0, 0, 1, 1], [], []>} : vector<512x16xf32>, vector<16x8xf32>, vector<512x8xf32> -> vector<512x8xf32>
    %c0_8 = arith.constant 0 : index
    %c0_9 = arith.constant 0 : index
    %9 = vector.load %arg5[%c0_8, %c0_9] : memref<1x8xf32, #tpu.memory_space<vmem>>, vector<1x8xf32>
    %10 = vector.broadcast %9 : vector<1x8xf32> to vector<512x8xf32>
    %11 = arith.addf %8, %10 : vector<512x8xf32>
    %c0_10 = arith.constant 0 : index
    %c0_11 = arith.constant 0 : index
    %12 = vector.load %arg10[%c0_10, %c0_11] : memref<512x8xf32, #tpu.memory_space<vmem>>, vector<512x8xf32>
    tpu.vector_store %arg10[%c0_10, %c0_11], %11 {strides = array<i32>} : memref<512x8xf32, #tpu.memory_space<vmem>>, vector<512x8xf32>,
    %c0_12 = arith.constant 0 : index
    %c0_13 = arith.constant 0 : index
    %13 = vector.load %arg6[%c0_12, %c0_13] : memref<8x16xf32, #tpu.memory_space<vmem>>, vector<8x16xf32>
    %cst_14 = arith.constant dense<0.000000e+00> : vector<512x16xf32>
    %14 = tpu.matmul %11, %13, %cst_14 {dimension_numbers = #tpu.dot_dimension_numbers<[1], [0], [0], [1], [0, 0, 1, 1], [], []>} : vector<512x8xf32>, vector<8x16xf32>, vector<512x16xf32> -> vector<512x16xf32>
    %c0_15 = arith.constant 0 : index
    %c0_16 = arith.constant 0 : index
    %15 = vector.load %arg7[%c0_15, %c0_16] : memref<1x16xf32, #tpu.memory_space<vmem>>, vector<1x16xf32>
    %16 = vector.broadcast %15 : vector<1x16xf32> to vector<512x16xf32>
    %17 = arith.addf %14, %16 : vector<512x16xf32>
    %18 = math.tanh %17 : vector<512x16xf32>
    %c0_17 = arith.constant 0 : index
    %c0_18 = arith.constant 0 : index
    %19 = vector.load %arg8[%c0_17, %c0_18] : memref<16x32xf32, #tpu.memory_space<vmem>>, vector<16x32xf32>
    %cst_19 = arith.constant dense<0.000000e+00> : vector<512x32xf32>
    %20 = tpu.matmul %18, %19, %cst_19 {dimension_numbers = #tpu.dot_dimension_numbers<[1], [0], [0], [1], [0, 0, 1, 1], [], []>} : vector<512x16xf32>, vector<16x32xf32>, vector<512x32xf32> -> vector<512x32xf32>
    %c0_20 = arith.constant 0 : index
    %c0_21 = arith.constant 0 : index
    %21 = vector.load %arg9[%c0_20, %c0_21] : memref<1x32xf32, #tpu.memory_space<vmem>>, vector<1x32xf32>
    %22 = vector.broadcast %21 : vector<1x32xf32> to vector<512x32xf32>
    %23 = arith.addf %20, %22 : vector<512x32xf32>
    %c0_22 = arith.constant 0 : index
    %c0_23 = arith.constant 0 : index
    %24 = vector.load %arg11[%c0_22, %c0_23] : memref<512x32xf32, #tpu.memory_space<vmem>>, vector<512x32xf32>
    tpu.vector_store %arg11[%c0_22, %c0_23], %23 {strides = array<i32>} : memref<512x32xf32, #tpu.memory_space<vmem>>, vector<512x32xf32>,
    return
  }
  func.func @transform_0(%arg0: i32) -> (i32, i32) {
    %c0_i32 = arith.constant 0 : i32
    %c0_i32_0 = arith.constant 0 : i32
    return %arg0, %c0_i32 : i32, i32
  }
  func.func @transform_1(%arg0: i32) -> (i32, i32) {
    %c0_i32 = arith.constant 0 : i32
    %c0_i32_0 = arith.constant 0 : i32
    %c0_i32_1 = arith.constant 0 : i32
    return %c0_i32, %c0_i32_0 : i32, i32
  }
  func.func @transform_2(%arg0: i32) -> (i32, i32) {
    %c0_i32 = arith.constant 0 : i32
    %c0_i32_0 = arith.constant 0 : i32
    %c0_i32_1 = arith.constant 0 : i32
    return %c0_i32, %c0_i32_0 : i32, i32
  }
  func.func @transform_3(%arg0: i32) -> (i32, i32) {
    %c0_i32 = arith.constant 0 : i32
    %c0_i32_0 = arith.constant 0 : i32
    %c0_i32_1 = arith.constant 0 : i32
    return %c0_i32, %c0_i32_0 : i32, i32
  }
  func.func @transform_4(%arg0: i32) -> (i32, i32) {
    %c0_i32 = arith.constant 0 : i32
    %c0_i32_0 = arith.constant 0 : i32
    %c0_i32_1 = arith.constant 0 : i32
    return %c0_i32, %c0_i32_0 : i32, i32
  }
  func.func @transform_5(%arg0: i32) -> (i32, i32) {
    %c0_i32 = arith.constant 0 : i32
    %c0_i32_0 = arith.constant 0 : i32
    %c0_i32_1 = arith.constant 0 : i32
    return %c0_i32, %c0_i32_0 : i32, i32
  }
  func.func @transform_6(%arg0: i32) -> (i32, i32) {
    %c0_i32 = arith.constant 0 : i32
    %c0_i32_0 = arith.constant 0 : i32
    %c0_i32_1 = arith.constant 0 : i32
    return %c0_i32, %c0_i32_0 : i32, i32
  }
  func.func @transform_7(%arg0: i32) -> (i32, i32) {
    %c0_i32 = arith.constant 0 : i32
    %c0_i32_0 = arith.constant 0 : i32
    %c0_i32_1 = arith.constant 0 : i32
    return %c0_i32, %c0_i32_0 : i32, i32
  }
  func.func @transform_8(%arg0: i32) -> (i32, i32) {
    %c0_i32 = arith.constant 0 : i32
    %c0_i32_0 = arith.constant 0 : i32
    %c0_i32_1 = arith.constant 0 : i32
    return %c0_i32, %c0_i32_0 : i32, i32
  }
  func.func @transform_9(%arg0: i32) -> (i32, i32) {
    %c0_i32 = arith.constant 0 : i32
    %c0_i32_0 = arith.constant 0 : i32
    return %arg0, %c0_i32 : i32, i32
  }
  func.func @transform_10(%arg0: i32) -> (i32, i32) {
    %c0_i32 = arith.constant 0 : i32
    %c0_i32_0 = arith.constant 0 : i32
    return %arg0, %c0_i32 : i32, i32
  }
}

</mosaic_0001>

<bundles_post_ra>
// kernel: autoencoder_forward.1
= control target key start
LH: loop header
LB: loop body
LE: loop exit
PB: predicated region body
PF: predicated region fallthrough
CT: control target
= control target key end

     0   :  { %s3023_s13 = smov 0   ;;  %s3953_s0 = inlined_call_operand.vmem [shape: f32[1024,32], index: 0, kind: input, shape index: {}]   ;;  %s3954_s1 = inlined_call_operand.vmem [shape: f32[32,16], index: 1, kind: input, shape index: {}]   ;;  %s3955_s2 = inlined_call_operand.vmem [shape: f32[1,16], index: 2, kind: input, shape index: {}]   ;;  %s3956_s3 = inlined_call_operand.vmem [shape: f32[16,8], index: 3, kind: input, shape index: {}]   ;;  %s3957_s4 = inlined_call_operand.vmem [shape: f32[1,8], index: 4, kind: input, shape index: {}]   ;;  %s3958_s5 = inlined_call_operand.vmem [shape: f32[8,16], index: 5, kind: input, shape index: {}]   ;;  %s3959_s6 = inlined_call_operand.vmem [shape: f32[1,16], index: 6, kind: input, shape index: {}]   ;;  %s3960_s7 = inlined_call_operand.vmem [shape: f32[16,32], index: 7, kind: input, shape index: {}]   ;;  %s3961_s8 = inlined_call_operand.vmem [shape: f32[1,32], index: 8, kind: input, shape index: {}]   ;;  %s3962_s9 = inlined_call_operand.vmem [shape: f32[1024,8], index: 9, kind: output, shape index: {0}]   ;;  %s3963_s10 = inlined_call_operand.vmem [shape: f32[1024,32], index: 10, kind: output, shape index: {1}]  }
   0x1 LB: > { %s2419_s14 = sadd.s32 4294967295, %s2966_s13   ;;  %p2423_p0 = scmp.ge.s32.totalorder %s2966_s13, 1  ;;  %s2966_s13 = sphi %s3023_s13, %s21_s13  }
   0x2   : > { %p316_p1 = scmp.lt.s32.totalorder %s2966_s13, 3 }
   0x4   : > { %p317_p2 = pnand %p2423_p0, %p316_p1 }
   0x5   : > { %s2424_s19 = sshll.u32 (!%p317_p2), %s2419_s14, 6 }
   0x6   : > { %320 = sbr.rel (%p317_p2) target bundleno = 1062 (0x426), region = 56  ;;  %p360_p3 = scmp.lt.s32.totalorder (!%p317_p2), %s2424_s19, 127 }
   0xb   : > { %v444_v0 = vld [vmem:[%s3954_s1 + $0x18] sm:$0xff]  ;;  %v443_v1 = vld [vmem:[%s3954_s1 + $0x10] sm:$0xff]  ;;  %v442_v2 = vld [vmem:[%s3954_s1 + $0x8] sm:$0xff]  ;;  %s3965_s19 = smov (!%p360_p3, %s2424_s19), 127  ;;  %vm449_vm0 = vcmask 261120   ;;  %vm921_vm1 = vcmask 130048  }
   0xc   : > { %654 = vmatpush.msra.mxu0 %v444_v0  ;;  %v441_v3 = vld [vmem:[%s3954_s1] sm:$0xff]  ;;  %s3043_s24 = sshll.u32 %s3965_s19, 3  ;;  %v916_v17 = vld [vmem:[%s3956_s3 + $0x8] sm:$0xff]  ;;  %vm1323_vm2 = vcmask 64512  }
   0xd   : > { %s3049_s27 = scalar_lea.vmem %s3953_s0, %s3043_s24  ;;  %1128 = vmatpush.msra.mxu1 %v916_v17  ;;  %v915_v19 = vld [vmem:[%s3956_s3] sm:$0xff]  ;;  %s3173_s21 = scalar_lea.vmem %s3962_s9, %s3043_s24 }
   0xe   : > { %655 = vmatpush.msra.mxu0 %v443_v1  ;;  %v377_v4 = vld [vmem:[%s3049_s27] sm:$0xff]  ;;  %v378_v5 = vld [vmem:[%s3049_s27 + $0x8] sm:$0xff]  ;;  %v379_v6 = vld [vmem:[%s3049_s27 + $0x10] sm:$0xff]  ;;  %s3507_s16 = scalar_lea.vmem %s3963_s10, %s3043_s24 }
   0xf   : > { %v380_v7 = vld [vmem:[%s3049_s27 + $0x18] sm:$0xff]  ;;  %v381_v8 = vld [vmem:[%s3049_s27 + $0x20] sm:$0xff]  ;;  %v382_v9 = vld [vmem:[%s3049_s27 + $0x28] sm:$0xff]  ;;  %1129 = vmatpush.msra.mxu1 %v915_v19 }
  0x10   : > { %656 = vmatpush.msra.mxu0 %v442_v2  ;;  %v383_v10 = vld [vmem:[%s3049_s27 + $0x30] sm:$0xff]  ;;  %v384_v11 = vld [vmem:[%s3049_s27 + $0x38] sm:$0xff]  ;;  %v385_v12 = vld [vmem:[%s3049_s27 + $0x40] sm:$0xff] }
  0x11   : > { %v386_v13 = vld [vmem:[%s3049_s27 + $0x48] sm:$0xff]  ;;  %v387_v14 = vld [vmem:[%s3049_s27 + $0x50] sm:$0xff]  ;;  %v388_v15 = vld [vmem:[%s3049_s27 + $0x58] sm:$0xff] }
  0x12   : > { %657 = vmatpush.msra.mxu0 %v441_v3  ;;  %v389_v16 = vld [vmem:[%s3049_s27 + $0x60] sm:$0xff]  ;;  %v390_v18 = vld [vmem:[%s3049_s27 + $0x68] sm:$0xff]  ;;  %v391_v20 = vld [vmem:[%s3049_s27 + $0x70] sm:$0xff] }
  0x13   : > { %2430 = vmatmul.msk.f32.vlgmr.msra.gmra.mxu0 %vm449_vm0, %v377_v4  ;;  %v392_v21 = vld [vmem:[%s3049_s27 + $0x78] sm:$0xff]  ;;  %v3092_v22 = vld [vmem:[%s3955_s2] ss:$0 sm:$0xff]  ;;  %v394_v27 = vld [vmem:[%s3049_s27 + $0x88] sm:$0xff] }
  0x14   : > { %v393_v24 = vld [vmem:[%s3049_s27 + $0x80] sm:$0xff]  ;;  %v395_v31 = vld [vmem:[%s3049_s27 + $0x90] sm:$0xff]  ;;  %v396_v35 = vld [vmem:[%s3049_s27 + $0x98] sm:$0xff] }
  0x15   : > { %v397_v39 = vld [vmem:[%s3049_s27 + $0xa0] sm:$0xff]  ;;  %v398_v43 = vld [vmem:[%s3049_s27 + $0xa8] sm:$0xff]  ;;  %v399_v47 = vld [vmem:[%s3049_s27 + $0xb0] sm:$0xff] }
  0x16   : > { %v400_v51 = vld [vmem:[%s3049_s27 + $0xb8] sm:$0xff]  ;;  %v401_v55 = vld [vmem:[%s3049_s27 + $0xc0] sm:$0xff]  ;;  %v402_v59 = vld [vmem:[%s3049_s27 + $0xc8] sm:$0xff] }
  0x17   : > { %v403_v63 = vld [vmem:[%s3049_s27 + $0xd0] sm:$0xff]  ;;  %v404_v3 = vld [vmem:[%s3049_s27 + $0xd8] sm:$0xff] }
  0x1b   : > { %2431 = vmatmul.msk.f32.gmra.mxu0 %vm449_vm0, %v378_v5 }
  0x23   : > { %2432 = vmatmul.msk.f32.gmra.mxu0 %vm449_vm0, %v379_v6 }
  0x2b   : > { %2433 = vmatmul.msk.f32.gmra.mxu0 %vm449_vm0, %v380_v7  ;;  %v405_v7 = vld [vmem:[%s3049_s27 + $0xe0] sm:$0xff] }
  0x33   : > { %2434 = vmatmul.msk.f32.gmra.mxu0 %vm449_vm0, %v381_v8 }
  0x3b   : > { %2435 = vmatmul.msk.f32.gmra.mxu0 %vm449_vm0, %v382_v9 }
  0x43   : > { %2436 = vmatmul.msk.f32.gmra.mxu0 %vm449_vm0, %v383_v10 }
  0x4b   : > { %2437 = vmatmul.msk.f32.gmra.mxu0 %vm449_vm0, %v384_v11  ;;  %v406_v11 = vld [vmem:[%s3049_s27 + $0xe8] sm:$0xff] }
  0x53   : > { %2438 = vmatmul.msk.f32.gmra.mxu0 %vm449_vm0, %v385_v12  ;;  %v1388_v12 = vld [vmem:[%s3958_s5] sm:$0xff] }
  0x54   : > { %1600 = vmatpush.msra.mxu2 %v1388_v12 }
  0x5b   : > { %2439 = vmatmul.msk.f32.gmra.mxu0 %vm449_vm0, %v386_v13 }
  0x63   : > { %2440 = vmatmul.msk.f32.gmra.mxu0 %vm449_vm0, %v387_v14 }
  0x6b   : > { %2441 = vmatmul.msk.f32.gmra.mxu0 %vm449_vm0, %v388_v15 }
  0x73   : > { %2442 = vmatmul.msk.f32.gmra.mxu0 %vm449_vm0, %v389_v16  ;;  %v407_v16 = vld [vmem:[%s3049_s27 + $0xf0] sm:$0xff] }
  0x7b   : > { %2443 = vmatmul.msk.f32.gmra.mxu0 %vm449_vm0, %v390_v18 }
  0x83   : > { %2444 = vmatmul.msk.f32.gmra.mxu0 %vm449_vm0, %v391_v20  ;;  %v408_v20 = vld [vmem:[%s3049_s27 + $0xf8] sm:$0xff] }
  0x8b   : > { %2445 = vmatmul.msk.f32.gmra.mxu0 %vm449_vm0, %v392_v21 }
  0x90   : > { %v659_v23 = vpop.f32.mrf.mxu0 }
  0x91   : > { %v660_v25 = vadd.f32 %v3092_v22, %v659_v23 }
  0x93   : > { %2700 = vtanh.f32 %v660_v25  ;;  %2446 = vmatmul.msk.f32.gmra.mxu0 %vm449_vm0, %v393_v24  ;;  %v409_v25 = vld [vmem:[%s3049_s27 + $0x100] sm:$0xff] }
  0x98   : > { %v662_v26 = vpop.f32.mrf.mxu0 }
  0x99   : > { %v2701_v28 = vpop.eup %2700  ;;  %v663_v29 = vadd.f32 %v3092_v22, %v662_v26 }
  0x9a   : > { %2494 = vmatmul.msk.f32.vlgmr.msra.gmra.mxu1 %vm921_vm1, %v2701_v28  ;;  %v3167_v28 = vld [vmem:[%s3957_s4] ss:$0 sm:$0xff] }
  0x9b   : > { %2702 = vtanh.f32 %v663_v29  ;;  %2447 = vmatmul.msk.f32.gmra.mxu0 %vm449_vm0, %v394_v27 }
  0xa0   : > { %v665_v30 = vpop.f32.mrf.mxu0 }
  0xa1   : > { %v2703_v32 = vpop.eup %2702  ;;  %v666_v33 = vadd.f32 %v3092_v22, %v665_v30 }
  0xa2   : > { %2495 = vmatmul.msk.f32.gmra.mxu1 %vm921_vm1, %v2703_v32  ;;  %v410_v32 = vld [vmem:[%s3049_s27 + $0x108] sm:$0xff] }
  0xa3   : > { %2704 = vtanh.f32 %v666_v33  ;;  %2448 = vmatmul.msk.f32.gmra.mxu0 %vm449_vm0, %v395_v31 }
  0xa8   : > { %v668_v34 = vpop.f32.mrf.mxu0 }
  0xa9   : > { %v2705_v36 = vpop.eup %2704  ;;  %v669_v37 = vadd.f32 %v3092_v22, %v668_v34 }
  0xaa   : > { %2496 = vmatmul.msk.f32.gmra.mxu1 %vm921_vm1, %v2705_v36 }
  0xab   : > { %2706 = vtanh.f32 %v669_v37  ;;  %2449 = vmatmul.msk.f32.gmra.mxu0 %vm449_vm0, %v396_v35 }
  0xb0   : > { %v671_v38 = vpop.f32.mrf.mxu0 }
  0xb1   : > { %v2707_v40 = vpop.eup %2706  ;;  %v672_v41 = vadd.f32 %v3092_v22, %v671_v38  ;;  %v411_v38 = vld [vmem:[%s3049_s27 + $0x110] sm:$0xff] }
  0xb2   : > { %2497 = vmatmul.msk.f32.gmra.mxu1 %vm921_vm1, %v2707_v40 }
  0xb3   : > { %2708 = vtanh.f32 %v672_v41  ;;  %2450 = vmatmul.msk.f32.gmra.mxu0 %vm449_vm0, %v397_v39 }
  0xb8   : > { %v674_v42 = vpop.f32.mrf.mxu0 }
  0xb9   : > { %v2709_v44 = vpop.eup %2708  ;;  %v675_v45 = vadd.f32 %v3092_v22, %v674_v42 }
  0xba   : > { %2498 = vmatmul.msk.f32.gmra.mxu1 %vm921_vm1, %v2709_v44  ;;  %v412_v44 = vld [vmem:[%s3049_s27 + $0x118] sm:$0xff] }
  0xbb   : > { %2710 = vtanh.f32 %v675_v45  ;;  %2451 = vmatmul.msk.f32.gmra.mxu0 %vm449_vm0, %v398_v43 }
  0xc0   : > { %v677_v46 = vpop.f32.mrf.mxu0 }
  0xc1   : > { %v2711_v48 = vpop.eup %2710  ;;  %v678_v49 = vadd.f32 %v3092_v22, %v677_v46 }
  0xc2   : > { %2499 = vmatmul.msk.f32.gmra.mxu1 %vm921_vm1, %v2711_v48 }
  0xc3   : > { %2712 = vtanh.f32 %v678_v49  ;;  %2452 = vmatmul.msk.f32.gmra.mxu0 %vm449_vm0, %v399_v47 }
  0xc8   : > { %v680_v50 = vpop.f32.mrf.mxu0 }
  0xc9   : > { %v2713_v52 = vpop.eup %2712  ;;  %v681_v53 = vadd.f32 %v3092_v22, %v680_v50  ;;  %v413_v50 = vld [vmem:[%s3049_s27 + $0x120] sm:$0xff] }
  0xca   : > { %2500 = vmatmul.msk.f32.gmra.mxu1 %vm921_vm1, %v2713_v52 }
  0xcb   : > { %2714 = vtanh.f32 %v681_v53  ;;  %2453 = vmatmul.msk.f32.gmra.mxu0 %vm449_vm0, %v400_v51 }
  0xd0   : > { %v683_v54 = vpop.f32.mrf.mxu0 }
  0xd1   : > { %v2715_v56 = vpop.eup %2714  ;;  %v684_v57 = vadd.f32 %v3092_v22, %v683_v54 }
  0xd2   : > { %2501 = vmatmul.msk.f32.gmra.mxu1 %vm921_vm1, %v2715_v56  ;;  %v414_v56 = vld [vmem:[%s3049_s27 + $0x128] sm:$0xff] }
  0xd3   : > { %2716 = vtanh.f32 %v684_v57  ;;  %2454 = vmatmul.msk.f32.gmra.mxu0 %vm449_vm0, %v401_v55 }
  0xd8   : > { %v686_v58 = vpop.f32.mrf.mxu0 }
  0xd9   : > { %v2717_v60 = vpop.eup %2716  ;;  %v687_v61 = vadd.f32 %v3092_v22, %v686_v58 }
  0xda   : > { %2502 = vmatmul.msk.f32.gmra.mxu1 %vm921_vm1, %v2717_v60 }
  0xdb   : > { %2718 = vtanh.f32 %v687_v61  ;;  %2455 = vmatmul.msk.f32.gmra.mxu0 %vm449_vm0, %v402_v59 }
  0xe0   : > { %v689_v62 = vpop.f32.mrf.mxu0 }
  0xe1   : > { %v2719_v0 = vpop.eup %2718  ;;  %v690_v1 = vadd.f32 %v3092_v22, %v689_v62  ;;  %v415_v62 = vld [vmem:[%s3049_s27 + $0x130] sm:$0xff] }
  0xe2   : > { %2503 = vmatmul.msk.f32.gmra.mxu1 %vm921_vm1, %v2719_v0 }
  0xe3   : > { %2720 = vtanh.f32 %v690_v1  ;;  %2456 = vmatmul.msk.f32.gmra.mxu0 %vm449_vm0, %v403_v63 }
  0xe8   : > { %v692_v2 = vpop.f32.mrf.mxu0 }
  0xe9   : > { %v2721_v4 = vpop.eup %2720  ;;  %v693_v5 = vadd.f32 %v3092_v22, %v692_v2 }
  0xea   : > { %2504 = vmatmul.msk.f32.gmra.mxu1 %vm921_vm1, %v2721_v4  ;;  %v416_v4 = vld [vmem:[%s3049_s27 + $0x138] sm:$0xff] }
  0xeb   : > { %2722 = vtanh.f32 %v693_v5  ;;  %2457 = vmatmul.msk.f32.gmra.mxu0 %vm449_vm0, %v404_v3 }
  0xf0   : > { %v695_v6 = vpop.f32.mrf.mxu0 }
  0xf1   : > { %v2723_v8 = vpop.eup %2722  ;;  %v696_v9 = vadd.f32 %v3092_v22, %v695_v6 }
  0xf2   : > { %2505 = vmatmul.msk.f32.gmra.mxu1 %vm921_vm1, %v2723_v8 }
  0xf3   : > { %2724 = vtanh.f32 %v696_v9  ;;  %2458 = vmatmul.msk.f32.gmra.mxu0 %vm449_vm0, %v405_v7 }
  0xf8   : > { %v698_v10 = vpop.f32.mrf.mxu0 }
  0xf9   : > { %v2725_v13 = vpop.eup %2724  ;;  %v699_v14 = vadd.f32 %v3092_v22, %v698_v10  ;;  %v417_v10 = vld [vmem:[%s3049_s27 + $0x140] sm:$0xff] }
  0xfa   : > { %2506 = vmatmul.msk.f32.gmra.mxu1 %vm921_vm1, %v2725_v13 }
  0xfb   : > { %2726 = vtanh.f32 %v699_v14  ;;  %2459 = vmatmul.msk.f32.gmra.mxu0 %vm449_vm0, %v406_v11 }
 0x100   : > { %v701_v15 = vpop.f32.mrf.mxu0 }
 0x101   : > { %v2727_v17 = vpop.eup %2726  ;;  %v702_v18 = vadd.f32 %v3092_v22, %v701_v15 }
 0x102   : > { %2507 = vmatmul.msk.f32.gmra.mxu1 %vm921_vm1, %v2727_v17 }
 0x103   : > { %2728 = vtanh.f32 %v702_v18  ;;  %2460 = vmatmul.msk.f32.gmra.mxu0 %vm449_vm0, %v407_v16  ;;  %v418_v16 = vld [vmem:[%s3049_s27 + $0x148] sm:$0xff] }
 0x108   : > { %v704_v19 = vpop.f32.mrf.mxu0 }
 0x109   : > { %v2729_v21 = vpop.eup %2728  ;;  %v705_v23 = vadd.f32 %v3092_v22, %v704_v19 }
 0x10a   : > { %2508 = vmatmul.msk.f32.gmra.mxu1 %vm921_vm1, %v2729_v21 }
 0x10b   : > { %2730 = vtanh.f32 %v705_v23  ;;  %2461 = vmatmul.msk.f32.gmra.mxu0 %vm449_vm0, %v408_v20  ;;  %v419_v23 = vld [vmem:[%s3049_s27 + $0x150] sm:$0xff] }
 0x110   : > { %v707_v24 = vpop.f32.mrf.mxu0 }
 0x111   : > { %v2731_v26 = vpop.eup %2730  ;;  %v708_v27 = vadd.f32 %v3092_v22, %v707_v24 }
 0x112   : > { %2509 = vmatmul.msk.f32.gmra.mxu1 %vm921_vm1, %v2731_v26 }
 0x113   : > { %2732 = vtanh.f32 %v708_v27  ;;  %2462 = vmatmul.msk.f32.gmra.mxu0 %vm449_vm0, %v409_v25 }
 0x117   : > { %v1131_v29 = vpop.f32.mrf.mxu1 }
 0x118   : > { %v1132_v30 = vadd.f32 %v3167_v28, %v1131_v29  ;;  %v710_v31 = vpop.f32.mrf.mxu0 }
 0x119   : > { %v2733_v33 = vpop.eup %2732  ;;  %v711_v34 = vadd.f32 %v3092_v22, %v710_v31 }
 0x11a   : > { %1324 = vst.msk [vmem:[%s3173_s21] sm:$0xff] %vm1323_vm2, %v1132_v30  ;;  %2510 = vmatmul.msk.f32.gmra.mxu1 %vm921_vm1, %v2733_v33  ;;  %2558 = vmatmul.msk.f32.vlgmr.msra.gmra.mxu2 %vm1323_vm2, %v1132_v30  ;;  %v420_v30 = vld [vmem:[%s3049_s27 + $0x158] sm:$0xff] }
 0x11b   : > { %2734 = vtanh.f32 %v711_v34  ;;  %2463 = vmatmul.msk.f32.gmra.mxu0 %vm449_vm0, %v410_v32 }
 0x11f   : > { %v1134_v35 = vpop.f32.mrf.mxu1 }
 0x120   : > { %v1135_v36 = vadd.f32 %v3167_v28, %v1134_v35  ;;  %v713_v37 = vpop.f32.mrf.mxu0 }
 0x121   : > { %v2735_v39 = vpop.eup %2734  ;;  %v714_v40 = vadd.f32 %v3092_v22, %v713_v37 }
 0x122   : > { %1325 = vst.msk [vmem:[%s3173_s21 + $0x8] sm:$0xff] %vm1323_vm2, %v1135_v36  ;;  %2511 = vmatmul.msk.f32.gmra.mxu1 %vm921_vm1, %v2735_v39  ;;  %2559 = vmatmul.msk.f32.gmra.mxu2 %vm1323_vm2, %v1135_v36  ;;  %v421_v36 = vld [vmem:[%s3049_s27 + $0x160] sm:$0xff] }
 0x123   : > { %2736 = vtanh.f32 %v714_v40  ;;  %2464 = vmatmul.msk.f32.gmra.mxu0 %vm449_vm0, %v411_v38 }
 0x127   : > { %v1137_v41 = vpop.f32.mrf.mxu1 }
 0x128   : > { %v1138_v42 = vadd.f32 %v3167_v28, %v1137_v41  ;;  %v716_v43 = vpop.f32.mrf.mxu0 }
 0x129   : > { %v2737_v45 = vpop.eup %2736  ;;  %v717_v46 = vadd.f32 %v3092_v22, %v716_v43 }
 0x12a   : > { %1326 = vst.msk [vmem:[%s3173_s21 + $0x10] sm:$0xff] %vm1323_vm2, %v1138_v42  ;;  %2512 = vmatmul.msk.f32.gmra.mxu1 %vm921_vm1, %v2737_v45  ;;  %2560 = vmatmul.msk.f32.gmra.mxu2 %vm1323_vm2, %v1138_v42  ;;  %v422_v42 = vld [vmem:[%s3049_s27 + $0x168] sm:$0xff] }
 0x12b   : > { %2738 = vtanh.f32 %v717_v46  ;;  %2465 = vmatmul.msk.f32.gmra.mxu0 %vm449_vm0, %v412_v44 }
 0x12f   : > { %v1140_v47 = vpop.f32.mrf.mxu1 }
 0x130   : > { %v1141_v48 = vadd.f32 %v3167_v28, %v1140_v47  ;;  %v719_v49 = vpop.f32.mrf.mxu0 }
 0x131   : > { %v2739_v51 = vpop.eup %2738  ;;  %v720_v52 = vadd.f32 %v3092_v22, %v719_v49 }
 0x132   : > { %1327 = vst.msk [vmem:[%s3173_s21 + $0x18] sm:$0xff] %vm1323_vm2, %v1141_v48  ;;  %2513 = vmatmul.msk.f32.gmra.mxu1 %vm921_vm1, %v2739_v51  ;;  %2561 = vmatmul.msk.f32.gmra.mxu2 %vm1323_vm2, %v1141_v48  ;;  %v423_v48 = vld [vmem:[%s3049_s27 + $0x170] sm:$0xff]  ;;  %v1859_v51 = vld [vmem:[%s3960_s7 + $0x8] sm:$0xff] }
 0x133   : > { %2740 = vtanh.f32 %v720_v52  ;;  %2466 = vmatmul.msk.f32.gmra.mxu0 %vm449_vm0, %v413_v50  ;;  %2070 = vmatpush.msra.mxu3 %v1859_v51  ;;  %v1858_v52 = vld [vmem:[%s3960_s7] sm:$0xff]  ;;  %v431_v51 = vld [vmem:[%s3049_s27 + $0x1b0] sm:$0xff] }
 0x135   : > { %2071 = vmatpush.msra.mxu3 %v1858_v52 }
 0x137   : > { %v1143_v53 = vpop.f32.mrf.mxu1 }
 0x138   : > { %v1144_v54 = vadd.f32 %v3167_v28, %v1143_v53  ;;  %v722_v55 = vpop.f32.mrf.mxu0 }
 0x139   : > { %v2741_v57 = vpop.eup %2740  ;;  %v723_v58 = vadd.f32 %v3092_v22, %v722_v55 }
 0x13a   : > { %1328 = vst.msk [vmem:[%s3173_s21 + $0x20] sm:$0xff] %vm1323_vm2, %v1144_v54  ;;  %2514 = vmatmul.msk.f32.gmra.mxu1 %vm921_vm1, %v2741_v57  ;;  %2562 = vmatmul.msk.f32.gmra.mxu2 %vm1323_vm2, %v1144_v54 }
 0x13b   : > { %2742 = vtanh.f32 %v723_v58  ;;  %2467 = vmatmul.msk.f32.gmra.mxu0 %vm449_vm0, %v414_v56  ;;  %v424_v56 = vld [vmem:[%s3049_s27 + $0x178] sm:$0xff] }
 0x13f   : > { %v1146_v59 = vpop.f32.mrf.mxu1 }
 0x140   : > { %v1147_v60 = vadd.f32 %v3167_v28, %v1146_v59  ;;  %v725_v61 = vpop.f32.mrf.mxu0 }
 0x141   : > { %v2743_v63 = vpop.eup %2742  ;;  %v726_v0 = vadd.f32 %v3092_v22, %v725_v61 }
 0x142   : > { %1329 = vst.msk [vmem:[%s3173_s21 + $0x28] sm:$0xff] %vm1323_vm2, %v1147_v60  ;;  %2515 = vmatmul.msk.f32.gmra.mxu1 %vm921_vm1, %v2743_v63  ;;  %2563 = vmatmul.msk.f32.gmra.mxu2 %vm1323_vm2, %v1147_v60 }
 0x143   : > { %2744 = vtanh.f32 %v726_v0  ;;  %2468 = vmatmul.msk.f32.gmra.mxu0 %vm449_vm0, %v415_v62  ;;  %v425_v62 = vld [vmem:[%s3049_s27 + $0x180] sm:$0xff] }
 0x147   : > { %v1149_v1 = vpop.f32.mrf.mxu1 }
 0x148   : > { %v1150_v2 = vadd.f32 %v3167_v28, %v1149_v1  ;;  %v728_v3 = vpop.f32.mrf.mxu0 }
 0x149   : > { %v2745_v5 = vpop.eup %2744  ;;  %v729_v6 = vadd.f32 %v3092_v22, %v728_v3 }
 0x14a   : > { %1330 = vst.msk [vmem:[%s3173_s21 + $0x30] sm:$0xff] %vm1323_vm2, %v1150_v2  ;;  %2516 = vmatmul.msk.f32.gmra.mxu1 %vm921_vm1, %v2745_v5  ;;  %2564 = vmatmul.msk.f32.gmra.mxu2 %vm1323_vm2, %v1150_v2 }
 0x14b   : > { %2746 = vtanh.f32 %v729_v6  ;;  %2469 = vmatmul.msk.f32.gmra.mxu0 %vm449_vm0, %v416_v4  ;;  %v426_v4 = vld [vmem:[%s3049_s27 + $0x188] sm:$0xff] }
 0x14f   : > { %v1152_v7 = vpop.f32.mrf.mxu1 }
 0x150   : > { %v1153_v8 = vadd.f32 %v3167_v28, %v1152_v7  ;;  %v731_v9 = vpop.f32.mrf.mxu0  ;;  %v3319_v7 = vld [vmem:[%s3959_s6] ss:$0 sm:$0xff] }
 0x151   : > { %v2747_v11 = vpop.eup %2746  ;;  %v732_v12 = vadd.f32 %v3092_v22, %v731_v9 }
 0x152   : > { %1331 = vst.msk [vmem:[%s3173_s21 + $0x38] sm:$0xff] %vm1323_vm2, %v1153_v8  ;;  %2517 = vmatmul.msk.f32.gmra.mxu1 %vm921_vm1, %v2747_v11  ;;  %2565 = vmatmul.msk.f32.gmra.mxu2 %vm1323_vm2, %v1153_v8 }
 0x153   : > { %2748 = vtanh.f32 %v732_v12  ;;  %2470 = vmatmul.msk.f32.gmra.mxu0 %vm449_vm0, %v417_v10 }
 0x157   : > { %v1155_v13 = vpop.f32.mrf.mxu1 }
 0x158   : > { %v1156_v14 = vadd.f32 %v3167_v28, %v1155_v13  ;;  %v734_v15 = vpop.f32.mrf.mxu0  ;;  %v427_v13 = vld [vmem:[%s3049_s27 + $0x190] sm:$0xff] }
 0x159   : > { %v2749_v17 = vpop.eup %2748  ;;  %v735_v18 = vadd.f32 %v3092_v22, %v734_v15 }
 0x15a   : > { %1332 = vst.msk [vmem:[%s3173_s21 + $0x40] sm:$0xff] %vm1323_vm2, %v1156_v14  ;;  %2518 = vmatmul.msk.f32.gmra.mxu1 %vm921_vm1, %v2749_v17  ;;  %2566 = vmatmul.msk.f32.gmra.mxu2 %vm1323_vm2, %v1156_v14 }
 0x15b   : > { %2750 = vtanh.f32 %v735_v18  ;;  %2471 = vmatmul.msk.f32.gmra.mxu0 %vm449_vm0, %v418_v16 }
 0x15f   : > { %v1158_v19 = vpop.f32.mrf.mxu1 }
 0x160   : > { %v1159_v20 = vadd.f32 %v3167_v28, %v1158_v19  ;;  %v737_v21 = vpop.f32.mrf.mxu0 }
 0x161   : > { %v2751_v24 = vpop.eup %2750  ;;  %v738_v25 = vadd.f32 %v3092_v22, %v737_v21 }
 0x162   : > { %1333 = vst.msk [vmem:[%s3173_s21 + $0x48] sm:$0xff] %vm1323_vm2, %v1159_v20  ;;  %2519 = vmatmul.msk.f32.gmra.mxu1 %vm921_vm1, %v2751_v24  ;;  %2567 = vmatmul.msk.f32.gmra.mxu2 %vm1323_vm2, %v1159_v20 }
 0x163   : > { %2752 = vtanh.f32 %v738_v25  ;;  %2472 = vmatmul.msk.f32.gmra.mxu0 %vm449_vm0, %v419_v23  ;;  %v428_v23 = vld [vmem:[%s3049_s27 + $0x198] sm:$0xff] }
 0x167   : > { %v1161_v26 = vpop.f32.mrf.mxu1 }
 0x168   : > { %v1162_v27 = vadd.f32 %v3167_v28, %v1161_v26  ;;  %v740_v29 = vpop.f32.mrf.mxu0 }
 0x169   : > { %v2753_v31 = vpop.eup %2752  ;;  %v741_v32 = vadd.f32 %v3092_v22, %v740_v29 }
 0x16a   : > { %1334 = vst.msk [vmem:[%s3173_s21 + $0x50] sm:$0xff] %vm1323_vm2, %v1162_v27  ;;  %2520 = vmatmul.msk.f32.gmra.mxu1 %vm921_vm1, %v2753_v31  ;;  %2568 = vmatmul.msk.f32.gmra.mxu2 %vm1323_vm2, %v1162_v27 }
 0x16b   : > { %2754 = vtanh.f32 %v741_v32  ;;  %2473 = vmatmul.msk.f32.gmra.mxu0 %vm449_vm0, %v420_v30 }
 0x16f   : > { %v1164_v33 = vpop.f32.mrf.mxu1 }
 0x170   : > { %v1165_v34 = vadd.f32 %v3167_v28, %v1164_v33  ;;  %v743_v35 = vpop.f32.mrf.mxu0  ;;  %v429_v33 = vld [vmem:[%s3049_s27 + $0x1a0] sm:$0xff] }
 0x171   : > { %v2755_v37 = vpop.eup %2754  ;;  %v744_v38 = vadd.f32 %v3092_v22, %v743_v35 }
 0x172   : > { %1335 = vst.msk [vmem:[%s3173_s21 + $0x58] sm:$0xff] %vm1323_vm2, %v1165_v34  ;;  %2521 = vmatmul.msk.f32.gmra.mxu1 %vm921_vm1, %v2755_v37  ;;  %2569 = vmatmul.msk.f32.gmra.mxu2 %vm1323_vm2, %v1165_v34 }
 0x173   : > { %2756 = vtanh.f32 %v744_v38  ;;  %2474 = vmatmul.msk.f32.gmra.mxu0 %vm449_vm0, %v421_v36 }
 0x177   : > { %v1167_v39 = vpop.f32.mrf.mxu1 }
 0x178   : > { %v1168_v40 = vadd.f32 %v3167_v28, %v1167_v39  ;;  %v746_v41 = vpop.f32.mrf.mxu0 }
 0x179   : > { %v2757_v43 = vpop.eup %2756  ;;  %v747_v44 = vadd.f32 %v3092_v22, %v746_v41 }
 0x17a   : > { %1336 = vst.msk [vmem:[%s3173_s21 + $0x60] sm:$0xff] %vm1323_vm2, %v1168_v40  ;;  %2522 = vmatmul.msk.f32.gmra.mxu1 %vm921_vm1, %v2757_v43  ;;  %2570 = vmatmul.msk.f32.gmra.mxu2 %vm1323_vm2, %v1168_v40 }
 0x17b   : > { %2758 = vtanh.f32 %v747_v44  ;;  %2475 = vmatmul.msk.f32.gmra.mxu0 %vm449_vm0, %v422_v42  ;;  %v430_v42 = vld [vmem:[%s3049_s27 + $0x1a8] sm:$0xff] }
 0x17f   : > { %v1170_v45 = vpop.f32.mrf.mxu1 }
 0x180   : > { %v1171_v46 = vadd.f32 %v3167_v28, %v1170_v45  ;;  %v749_v47 = vpop.f32.mrf.mxu0 }
 0x181   : > { %v2759_v49 = vpop.eup %2758  ;;  %v750_v50 = vadd.f32 %v3092_v22, %v749_v47 }
 0x182   : > { %1337 = vst.msk [vmem:[%s3173_s21 + $0x68] sm:$0xff] %vm1323_vm2, %v1171_v46  ;;  %2523 = vmatmul.msk.f32.gmra.mxu1 %vm921_vm1, %v2759_v49  ;;  %2571 = vmatmul.msk.f32.gmra.mxu2 %vm1323_vm2, %v1171_v46 }
 0x183   : > { %2760 = vtanh.f32 %v750_v50  ;;  %2476 = vmatmul.msk.f32.gmra.mxu0 %vm449_vm0, %v423_v48 }
 0x187   : > { %v1173_v53 = vpop.f32.mrf.mxu1 }
 0x188   : > { %v1174_v54 = vadd.f32 %v3167_v28, %v1173_v53  ;;  %v752_v55 = vpop.f32.mrf.mxu0 }
 0x189   : > { %v2761_v57 = vpop.eup %2760  ;;  %v753_v58 = vadd.f32 %v3092_v22, %v752_v55 }
 0x18a   : > { %1338 = vst.msk [vmem:[%s3173_s21 + $0x70] sm:$0xff] %vm1323_vm2, %v1174_v54  ;;  %2524 = vmatmul.msk.f32.gmra.mxu1 %vm921_vm1, %v2761_v57  ;;  %2572 = vmatmul.msk.f32.gmra.mxu2 %vm1323_vm2, %v1174_v54 }
 0x18b   : > { %2762 = vtanh.f32 %v753_v58  ;;  %2477 = vmatmul.msk.f32.gmra.mxu0 %vm449_vm0, %v424_v56 }
 0x18f   : > { %v1176_v59 = vpop.f32.mrf.mxu1 }
 0x190   : > { %v1177_v60 = vadd.f32 %v3167_v28, %v1176_v59  ;;  %v755_v61 = vpop.f32.mrf.mxu0 }
 0x191   : > { %v2763_v63 = vpop.eup %2762  ;;  %v756_v0 = vadd.f32 %v3092_v22, %v755_v61 }
 0x192   : > { %1339 = vst.msk [vmem:[%s3173_s21 + $0x78] sm:$0xff] %vm1323_vm2, %v1177_v60  ;;  %2525 = vmatmul.msk.f32.gmra.mxu1 %vm921_vm1, %v2763_v63  ;;  %2573 = vmatmul.msk.f32.gmra.mxu2 %vm1323_vm2, %v1177_v60  ;;  %v432_v60 = vld [vmem:[%s3049_s27 + $0x1b8] sm:$0xff] }
 0x193   : > { %2764 = vtanh.f32 %v756_v0  ;;  %2478 = vmatmul.msk.f32.gmra.mxu0 %vm449_vm0, %v425_v62 }
 0x197   : > { %v1179_v1 = vpop.f32.mrf.mxu1 }
 0x198   : > { %v1180_v2 = vadd.f32 %v3167_v28, %v1179_v1  ;;  %v758_v3 = vpop.f32.mrf.mxu0 }
 0x199   : > { %v2765_v5 = vpop.eup %2764  ;;  %v759_v6 = vadd.f32 %v3092_v22, %v758_v3 }
 0x19a   : > { %1340 = vst.msk [vmem:[%s3173_s21 + $0x80] sm:$0xff] %vm1323_vm2, %v1180_v2  ;;  %2526 = vmatmul.msk.f32.gmra.mxu1 %vm921_vm1, %v2765_v5  ;;  %2574 = vmatmul.msk.f32.gmra.mxu2 %vm1323_vm2, %v1180_v2  ;;  %v433_v5 = vld [vmem:[%s3049_s27 + $0x1c0] sm:$0xff] }
 0x19b   : > { %2766 = vtanh.f32 %v759_v6  ;;  %2479 = vmatmul.msk.f32.gmra.mxu0 %vm449_vm0, %v426_v4 }
 0x19d   : > { %v1602_v8 = vpop.f32.mrf.mxu2 }
 0x19e   : > { %v1603_v9 = vadd.f32 %v3319_v7, %v1602_v8 }
 0x19f   : > { %v1182_v10 = vpop.f32.mrf.mxu1 }
 0x1a0   : > { %2768 = vtanh.f32 %v1603_v9  ;;  %v1183_v11 = vadd.f32 %v3167_v28, %v1182_v10  ;;  %v761_v12 = vpop.f32.mrf.mxu0 }
 0x1a1   : > { %v2767_v14 = vpop.eup %2766  ;;  %v762_v15 = vadd.f32 %v3092_v22, %v761_v12 }
 0x1a2   : > { %1341 = vst.msk [vmem:[%s3173_s21 + $0x88] sm:$0xff] %vm1323_vm2, %v1183_v11  ;;  %2527 = vmatmul.msk.f32.gmra.mxu1 %vm921_vm1, %v2767_v14  ;;  %2575 = vmatmul.msk.f32.gmra.mxu2 %vm1323_vm2, %v1183_v11 }
 0x1a3   : > { %2770 = vtanh.f32 %v762_v15  ;;  %2480 = vmatmul.msk.f32.gmra.mxu0 %vm449_vm0, %v427_v13  ;;  %v434_v15 = vld [vmem:[%s3049_s27 + $0x1c8] sm:$0xff] }
 0x1a5   : > { %v1605_v16 = vpop.f32.mrf.mxu2 }
 0x1a6   : > { %v2769_v17 = vpop.eup %2768  ;;  %v1606_v18 = vadd.f32 %v3319_v7, %v1605_v16 }
 0x1a7   : > { %v1185_v19 = vpop.f32.mrf.mxu1  ;;  %2622 = vmatmul.msk.f32.vlgmr.msra.gmra.mxu3 %vm921_vm1, %v2769_v17 }
 0x1a8   : > { %2772 = vtanh.f32 %v1606_v18  ;;  %v1186_v20 = vadd.f32 %v3167_v28, %v1185_v19  ;;  %v764_v21 = vpop.f32.mrf.mxu0 }
 0x1a9   : > { %v2771_v24 = vpop.eup %2770  ;;  %v765_v25 = vadd.f32 %v3092_v22, %v764_v21 }
 0x1aa   : > { %1342 = vst.msk [vmem:[%s3173_s21 + $0x90] sm:$0xff] %vm1323_vm2, %v1186_v20  ;;  %2528 = vmatmul.msk.f32.gmra.mxu1 %vm921_vm1, %v2771_v24  ;;  %2576 = vmatmul.msk.f32.gmra.mxu2 %vm1323_vm2, %v1186_v20 }
 0x1ab   : > { %2774 = vtanh.f32 %v765_v25  ;;  %2481 = vmatmul.msk.f32.gmra.mxu0 %vm449_vm0, %v428_v23  ;;  %v435_v25 = vld [vmem:[%s3049_s27 + $0x1d0] sm:$0xff] }
 0x1ad   : > { %v1608_v26 = vpop.f32.mrf.mxu2 }
 0x1ae   : > { %v2773_v27 = vpop.eup %2772  ;;  %v1609_v29 = vadd.f32 %v3319_v7, %v1608_v26 }
 0x1af   : > { %v1188_v30 = vpop.f32.mrf.mxu1  ;;  %2623 = vmatmul.msk.f32.gmra.mxu3 %vm921_vm1, %v2773_v27 }
 0x1b0   : > { %2776 = vtanh.f32 %v1609_v29  ;;  %v1189_v31 = vadd.f32 %v3167_v28, %v1188_v30  ;;  %v767_v32 = vpop.f32.mrf.mxu0 }
 0x1b1   : > { %v2775_v34 = vpop.eup %2774  ;;  %v768_v35 = vadd.f32 %v3092_v22, %v767_v32 }
 0x1b2   : > { %1343 = vst.msk [vmem:[%s3173_s21 + $0x98] sm:$0xff] %vm1323_vm2, %v1189_v31  ;;  %2529 = vmatmul.msk.f32.gmra.mxu1 %vm921_vm1, %v2775_v34  ;;  %2577 = vmatmul.msk.f32.gmra.mxu2 %vm1323_vm2, %v1189_v31 }
 0x1b3   : > { %2778 = vtanh.f32 %v768_v35  ;;  %2482 = vmatmul.msk.f32.gmra.mxu0 %vm449_vm0, %v429_v33  ;;  %v436_v35 = vld [vmem:[%s3049_s27 + $0x1d8] sm:$0xff] }
 0x1b5   : > { %v1611_v36 = vpop.f32.mrf.mxu2 }
 0x1b6   : > { %v2777_v37 = vpop.eup %2776  ;;  %v1612_v38 = vadd.f32 %v3319_v7, %v1611_v36 }
 0x1b7   : > { %v1191_v39 = vpop.f32.mrf.mxu1  ;;  %2624 = vmatmul.msk.f32.gmra.mxu3 %vm921_vm1, %v2777_v37 }
 0x1b8   : > { %2780 = vtanh.f32 %v1612_v38  ;;  %v1192_v40 = vadd.f32 %v3167_v28, %v1191_v39  ;;  %v770_v41 = vpop.f32.mrf.mxu0 }
 0x1b9   : > { %v2779_v43 = vpop.eup %2778  ;;  %v771_v44 = vadd.f32 %v3092_v22, %v770_v41 }
 0x1ba   : > { %1344 = vst.msk [vmem:[%s3173_s21 + $0xa0] sm:$0xff] %vm1323_vm2, %v1192_v40  ;;  %2530 = vmatmul.msk.f32.gmra.mxu1 %vm921_vm1, %v2779_v43  ;;  %2578 = vmatmul.msk.f32.gmra.mxu2 %vm1323_vm2, %v1192_v40 }
 0x1bb   : > { %2782 = vtanh.f32 %v771_v44  ;;  %2483 = vmatmul.msk.f32.gmra.mxu0 %vm449_vm0, %v430_v42  ;;  %v437_v44 = vld [vmem:[%s3049_s27 + $0x1e0] sm:$0xff] }
 0x1bd   : > { %v1614_v45 = vpop.f32.mrf.mxu2 }
 0x1be   : > { %v2781_v46 = vpop.eup %2780  ;;  %v1615_v47 = vadd.f32 %v3319_v7, %v1614_v45 }
 0x1bf   : > { %v1194_v48 = vpop.f32.mrf.mxu1  ;;  %2625 = vmatmul.msk.f32.gmra.mxu3 %vm921_vm1, %v2781_v46 }
 0x1c0   : > { %2784 = vtanh.f32 %v1615_v47  ;;  %v1195_v49 = vadd.f32 %v3167_v28, %v1194_v48  ;;  %v773_v50 = vpop.f32.mrf.mxu0 }
 0x1c1   : > { %v2783_v52 = vpop.eup %2782  ;;  %v774_v53 = vadd.f32 %v3092_v22, %v773_v50 }
 0x1c2   : > { %1345 = vst.msk [vmem:[%s3173_s21 + $0xa8] sm:$0xff] %vm1323_vm2, %v1195_v49  ;;  %2531 = vmatmul.msk.f32.gmra.mxu1 %vm921_vm1, %v2783_v52  ;;  %2579 = vmatmul.msk.f32.gmra.mxu2 %vm1323_vm2, %v1195_v49 }
 0x1c3   : > { %2786 = vtanh.f32 %v774_v53  ;;  %2484 = vmatmul.msk.f32.gmra.mxu0 %vm449_vm0, %v431_v51  ;;  %v438_v53 = vld [vmem:[%s3049_s27 + $0x1e8] sm:$0xff] }
 0x1c5   : > { %v1617_v54 = vpop.f32.mrf.mxu2 }
 0x1c6   : > { %v2785_v55 = vpop.eup %2784  ;;  %v1618_v56 = vadd.f32 %v3319_v7, %v1617_v54 }
 0x1c7   : > { %v1197_v57 = vpop.f32.mrf.mxu1  ;;  %2626 = vmatmul.msk.f32.gmra.mxu3 %vm921_vm1, %v2785_v55 }
 0x1c8   : > { %2788 = vtanh.f32 %v1618_v56  ;;  %v1198_v58 = vadd.f32 %v3167_v28, %v1197_v57  ;;  %v776_v59 = vpop.f32.mrf.mxu0 }
 0x1c9   : > { %v2787_v61 = vpop.eup %2786  ;;  %v777_v62 = vadd.f32 %v3092_v22, %v776_v59 }
 0x1ca   : > { %1346 = vst.msk [vmem:[%s3173_s21 + $0xb0] sm:$0xff] %vm1323_vm2, %v1198_v58  ;;  %2532 = vmatmul.msk.f32.gmra.mxu1 %vm921_vm1, %v2787_v61  ;;  %2580 = vmatmul.msk.f32.gmra.mxu2 %vm1323_vm2, %v1198_v58  ;;  %v439_v61 = vld [vmem:[%s3049_s27 + $0x1f0] sm:$0xff] }
 0x1cb   : > { %2790 = vtanh.f32 %v777_v62  ;;  %2485 = vmatmul.msk.f32.gmra.mxu0 %vm449_vm0, %v432_v60 }
 0x1cd   : > { %v1620_v63 = vpop.f32.mrf.mxu2 }
 0x1ce   : > { %v2789_v0 = vpop.eup %2788  ;;  %v1621_v1 = vadd.f32 %v3319_v7, %v1620_v63  ;;  %v3448_v63 = vld [vmem:[%s3955_s2] ss:$0 sm:$0xff] }
 0x1cf   : > { %v1200_v2 = vpop.f32.mrf.mxu1  ;;  %2627 = vmatmul.msk.f32.gmra.mxu3 %vm921_vm1, %v2789_v0 }
 0x1d0   : > { %2792 = vtanh.f32 %v1621_v1  ;;  %v1201_v3 = vadd.f32 %v3167_v28, %v1200_v2  ;;  %v779_v4 = vpop.f32.mrf.mxu0 }
 0x1d1   : > { %v2791_v6 = vpop.eup %2790  ;;  %v780_v8 = vadd.f32 %v3092_v22, %v779_v4 }
 0x1d2   : > { %1347 = vst.msk [vmem:[%s3173_s21 + $0xb8] sm:$0xff] %vm1323_vm2, %v1201_v3  ;;  %2533 = vmatmul.msk.f32.gmra.mxu1 %vm921_vm1, %v2791_v6  ;;  %2581 = vmatmul.msk.f32.gmra.mxu2 %vm1323_vm2, %v1201_v3 }
 0x1d3   : > { %2794 = vtanh.f32 %v780_v8  ;;  %2486 = vmatmul.msk.f32.gmra.mxu0 %vm449_vm0, %v433_v5  ;;  %v440_v8 = vld [vmem:[%s3049_s27 + $0x1f8] sm:$0xff] }
 0x1d5   : > { %v1623_v9 = vpop.f32.mrf.mxu2 }
 0x1d6   : > { %v2793_v10 = vpop.eup %2792  ;;  %v1624_v11 = vadd.f32 %v3319_v7, %v1623_v9 }
 0x1d7   : > { %v1203_v12 = vpop.f32.mrf.mxu1  ;;  %2628 = vmatmul.msk.f32.gmra.mxu3 %vm921_vm1, %v2793_v10 }
 0x1d8   : > { %2796 = vtanh.f32 %v1624_v11  ;;  %v1204_v13 = vadd.f32 %v3167_v28, %v1203_v12  ;;  %v782_v14 = vpop.f32.mrf.mxu0 }
 0x1d9   : > { %v2795_v16 = vpop.eup %2794  ;;  %v783_v17 = vadd.f32 %v3092_v22, %v782_v14 }
 0x1da   : > { %1348 = vst.msk [vmem:[%s3173_s21 + $0xc0] sm:$0xff] %vm1323_vm2, %v1204_v13  ;;  %2534 = vmatmul.msk.f32.gmra.mxu1 %vm921_vm1, %v2795_v16  ;;  %2582 = vmatmul.msk.f32.gmra.mxu2 %vm1323_vm2, %v1204_v13 }
 0x1db   : > { %2798 = vtanh.f32 %v783_v17  ;;  %2487 = vmatmul.msk.f32.gmra.mxu0 %vm449_vm0, %v434_v15 }
 0x1dd   : > { %v1626_v18 = vpop.f32.mrf.mxu2 }
 0x1de   : > { %v2797_v19 = vpop.eup %2796  ;;  %v1627_v20 = vadd.f32 %v3319_v7, %v1626_v18 }
 0x1df   : > { %v1206_v21 = vpop.f32.mrf.mxu1  ;;  %2629 = vmatmul.msk.f32.gmra.mxu3 %vm921_vm1, %v2797_v19 }
 0x1e0   : > { %2800 = vtanh.f32 %v1627_v20  ;;  %v1207_v23 = vadd.f32 %v3167_v28, %v1206_v21  ;;  %v785_v24 = vpop.f32.mrf.mxu0 }
 0x1e1   : > { %v2799_v26 = vpop.eup %2798  ;;  %v786_v27 = vadd.f32 %v3092_v22, %v785_v24 }
 0x1e2   : > { %1349 = vst.msk [vmem:[%s3173_s21 + $0xc8] sm:$0xff] %vm1323_vm2, %v1207_v23  ;;  %2535 = vmatmul.msk.f32.gmra.mxu1 %vm921_vm1, %v2799_v26  ;;  %2583 = vmatmul.msk.f32.gmra.mxu2 %vm1323_vm2, %v1207_v23 }
 0x1e3   : > { %2802 = vtanh.f32 %v786_v27  ;;  %2488 = vmatmul.msk.f32.gmra.mxu0 %vm449_vm0, %v435_v25 }
 0x1e5   : > { %v1629_v29 = vpop.f32.mrf.mxu2 }
 0x1e6   : > { %v2801_v30 = vpop.eup %2800  ;;  %v1630_v31 = vadd.f32 %v3319_v7, %v1629_v29 }
 0x1e7   : > { %v1209_v32 = vpop.f32.mrf.mxu1  ;;  %2630 = vmatmul.msk.f32.gmra.mxu3 %vm921_vm1, %v2801_v30 }
 0x1e8   : > { %2804 = vtanh.f32 %v1630_v31  ;;  %v1210_v33 = vadd.f32 %v3167_v28, %v1209_v32  ;;  %v788_v34 = vpop.f32.mrf.mxu0 }
 0x1e9   : > { %v2803_v36 = vpop.eup %2802  ;;  %v789_v37 = vadd.f32 %v3092_v22, %v788_v34 }
 0x1ea   : > { %1350 = vst.msk [vmem:[%s3173_s21 + $0xd0] sm:$0xff] %vm1323_vm2, %v1210_v33  ;;  %2536 = vmatmul.msk.f32.gmra.mxu1 %vm921_vm1, %v2803_v36  ;;  %2584 = vmatmul.msk.f32.gmra.mxu2 %vm1323_vm2, %v1210_v33 }
 0x1eb   : > { %2806 = vtanh.f32 %v789_v37  ;;  %2489 = vmatmul.msk.f32.gmra.mxu0 %vm449_vm0, %v436_v35 }
 0x1ed   : > { %v1632_v38 = vpop.f32.mrf.mxu2 }
 0x1ee   : > { %v2805_v39 = vpop.eup %2804  ;;  %v1633_v40 = vadd.f32 %v3319_v7, %v1632_v38 }
 0x1ef   : > { %v1212_v41 = vpop.f32.mrf.mxu1  ;;  %2631 = vmatmul.msk.f32.gmra.mxu3 %vm921_vm1, %v2805_v39 }
 0x1f0   : > { %2808 = vtanh.f32 %v1633_v40  ;;  %v1213_v42 = vadd.f32 %v3167_v28, %v1212_v41  ;;  %v791_v43 = vpop.f32.mrf.mxu0  ;;  %v3495_v41 = vld [vmem:[%s3961_s8] ss:$0 sm:$0xff] }
 0x1f1   : > { %v2807_v45 = vpop.eup %2806  ;;  %v792_v46 = vadd.f32 %v3092_v22, %v791_v43 }
 0x1f2   : > { %1351 = vst.msk [vmem:[%s3173_s21 + $0xd8] sm:$0xff] %vm1323_vm2, %v1213_v42  ;;  %2537 = vmatmul.msk.f32.gmra.mxu1 %vm921_vm1, %v2807_v45  ;;  %2585 = vmatmul.msk.f32.gmra.mxu2 %vm1323_vm2, %v1213_v42 }
 0x1f3   : > { %2810 = vtanh.f32 %v792_v46  ;;  %2490 = vmatmul.msk.f32.gmra.mxu0 %vm449_vm0, %v437_v44 }
 0x1f5   : > { %v1635_v47 = vpop.f32.mrf.mxu2 }
 0x1f6   : > { %v2809_v48 = vpop.eup %2808  ;;  %v1636_v49 = vadd.f32 %v3319_v7, %v1635_v47 }
 0x1f7   : > { %v1215_v50 = vpop.f32.mrf.mxu1  ;;  %2632 = vmatmul.msk.f32.gmra.mxu3 %vm921_vm1, %v2809_v48 }
 0x1f8   : > { %2812 = vtanh.f32 %v1636_v49  ;;  %v1216_v51 = vadd.f32 %v3167_v28, %v1215_v50  ;;  %v794_v52 = vpop.f32.mrf.mxu0 }
 0x1f9   : > { %v2811_v54 = vpop.eup %2810  ;;  %v795_v55 = vadd.f32 %v3092_v22, %v794_v52 }
 0x1fa   : > { %1352 = vst.msk [vmem:[%s3173_s21 + $0xe0] sm:$0xff] %vm1323_vm2, %v1216_v51  ;;  %2538 = vmatmul.msk.f32.gmra.mxu1 %vm921_vm1, %v2811_v54  ;;  %2586 = vmatmul.msk.f32.gmra.mxu2 %vm1323_vm2, %v1216_v51 }
 0x1fb   : > { %2814 = vtanh.f32 %v795_v55  ;;  %2491 = vmatmul.msk.f32.gmra.mxu0 %vm449_vm0, %v438_v53 }
 0x1fd   : > { %v1638_v56 = vpop.f32.mrf.mxu2 }
 0x1fe   : > { %v2813_v57 = vpop.eup %2812  ;;  %v1639_v58 = vadd.f32 %v3319_v7, %v1638_v56 }
 0x1ff   : > { %v1218_v59 = vpop.f32.mrf.mxu1  ;;  %2633 = vmatmul.msk.f32.gmra.mxu3 %vm921_vm1, %v2813_v57 }
 0x200   : > { %2816 = vtanh.f32 %v1639_v58  ;;  %v1219_v22 = vadd.f32 %v3167_v28, %v1218_v59  ;;  %v797_v60 = vpop.f32.mrf.mxu0 }
 0x201   : > { %v2815_v62 = vpop.eup %2814  ;;  %v798_v0 = vadd.f32 %v3448_v63, %v797_v60 }
 0x202   : > { %1353 = vst.msk [vmem:[%s3173_s21 + $0xe8] sm:$0xff] %vm1323_vm2, %v1219_v22  ;;  %2539 = vmatmul.msk.f32.gmra.mxu1 %vm921_vm1, %v2815_v62  ;;  %2587 = vmatmul.msk.f32.gmra.mxu2 %vm1323_vm2, %v1219_v22 }
 0x203   : > { %2818 = vtanh.f32 %v798_v0  ;;  %2492 = vmatmul.msk.f32.gmra.mxu0 %vm449_vm0, %v439_v61 }
 0x205   : > { %v1641_v1 = vpop.f32.mrf.mxu2 }
 0x206   : > { %v2817_v2 = vpop.eup %2816  ;;  %v1642_v3 = vadd.f32 %v3319_v7, %v1641_v1 }
 0x207   : > { %v1221_v4 = vpop.f32.mrf.mxu1  ;;  %2634 = vmatmul.msk.f32.gmra.mxu3 %vm921_vm1, %v2817_v2 }
 0x208   : > { %2820 = vtanh.f32 %v1642_v3  ;;  %v1222_v5 = vadd.f32 %v3167_v28, %v1221_v4  ;;  %v800_v6 = vpop.f32.mrf.mxu0 }
 0x209   : > { %v2819_v9 = vpop.eup %2818  ;;  %v801_v10 = vadd.f32 %v3448_v63, %v800_v6 }
 0x20a   : > { %1354 = vst.msk [vmem:[%s3173_s21 + $0xf0] sm:$0xff] %vm1323_vm2, %v1222_v5  ;;  %2540 = vmatmul.msk.f32.gmra.mxu1 %vm921_vm1, %v2819_v9  ;;  %2588 = vmatmul.msk.f32.gmra.mxu2 %vm1323_vm2, %v1222_v5 }
 0x20b   : > { %2822 = vtanh.f32 %v801_v10  ;;  %2493 = vmatmul.msk.f32.gmra.mxu0 %vm449_vm0, %v440_v8  ;;  %v3539_v8 = vld [vmem:[%s3957_s4] ss:$0 sm:$0xff] }
 0x20d   : > { %v1644_v11 = vpop.f32.mrf.mxu2 }
 0x20e   : > { %v2821_v12 = vpop.eup %2820  ;;  %v1645_v13 = vadd.f32 %v3319_v7, %v1644_v11 }
 0x20f   : > { %v1224_v14 = vpop.f32.mrf.mxu1  ;;  %2635 = vmatmul.msk.f32.gmra.mxu3 %vm921_vm1, %v2821_v12 }
 0x210   : > { %2824 = vtanh.f32 %v1645_v13  ;;  %v1225_v15 = vadd.f32 %v3167_v28, %v1224_v14  ;;  %v803_v16 = vpop.f32.mrf.mxu0 }
 0x211   : > { %v2823_v17 = vpop.eup %2822  ;;  %v804_v18 = vadd.f32 %v3448_v63, %v803_v16 }
 0x212   : > { %1355 = vst.msk [vmem:[%s3173_s21 + $0xf8] sm:$0xff] %vm1323_vm2, %v1225_v15  ;;  %2541 = vmatmul.msk.f32.gmra.mxu1 %vm921_vm1, %v2823_v17  ;;  %2589 = vmatmul.msk.f32.gmra.mxu2 %vm1323_vm2, %v1225_v15 }
 0x213   : > { %2826 = vtanh.f32 %v804_v18 }
 0x215   : > { %v1647_v19 = vpop.f32.mrf.mxu2 }
 0x216   : > { %v2825_v20 = vpop.eup %2824  ;;  %v1648_v21 = vadd.f32 %v3319_v7, %v1647_v19 }
 0x217   : > { %v1227_v23 = vpop.f32.mrf.mxu1  ;;  %2636 = vmatmul.msk.f32.gmra.mxu3 %vm921_vm1, %v2825_v20 }
 0x218   : > { %2828 = vtanh.f32 %v1648_v21  ;;  %v1228_v24 = vadd.f32 %v3167_v28, %v1227_v23  ;;  %v806_v25 = vpop.f32.mrf.mxu0 }
 0x219   : > { %v2827_v26 = vpop.eup %2826  ;;  %v807_v27 = vadd.f32 %v3448_v63, %v806_v25 }
 0x21a   : > { %1356 = vst.msk [vmem:[%s3173_s21 + $0x100] sm:$0xff] %vm1323_vm2, %v1228_v24  ;;  %2542 = vmatmul.msk.f32.gmra.mxu1 %vm921_vm1, %v2827_v26  ;;  %2590 = vmatmul.msk.f32.gmra.mxu2 %vm1323_vm2, %v1228_v24 }
 0x21b   : > { %2830 = vtanh.f32 %v807_v27 }
 0x21d   : > { %v1650_v29 = vpop.f32.mrf.mxu2 }
 0x21e   : > { %v2829_v30 = vpop.eup %2828  ;;  %v1651_v31 = vadd.f32 %v3319_v7, %v1650_v29 }
 0x21f   : > { %v1230_v32 = vpop.f32.mrf.mxu1  ;;  %2637 = vmatmul.msk.f32.gmra.mxu3 %vm921_vm1, %v2829_v30 }
 0x220   : > { %2832 = vtanh.f32 %v1651_v31  ;;  %v1231_v33 = vadd.f32 %v3167_v28, %v1230_v32  ;;  %v809_v34 = vpop.f32.mrf.mxu0 }
 0x221   : > { %v2831_v35 = vpop.eup %2830  ;;  %v810_v36 = vadd.f32 %v3448_v63, %v809_v34 }
 0x222   : > { %1357 = vst.msk [vmem:[%s3173_s21 + $0x108] sm:$0xff] %vm1323_vm2, %v1231_v33  ;;  %2543 = vmatmul.msk.f32.gmra.mxu1 %vm921_vm1, %v2831_v35  ;;  %2591 = vmatmul.msk.f32.gmra.mxu2 %vm1323_vm2, %v1231_v33 }
 0x223   : > { %2834 = vtanh.f32 %v810_v36 }
 0x225   : > { %v1653_v37 = vpop.f32.mrf.mxu2 }
 0x226   : > { %v2833_v38 = vpop.eup %2832  ;;  %v1654_v39 = vadd.f32 %v3319_v7, %v1653_v37 }
 0x227   : > { %v1233_v40 = vpop.f32.mrf.mxu1  ;;  %2638 = vmatmul.msk.f32.gmra.mxu3 %vm921_vm1, %v2833_v38 }
 0x228   : > { %2836 = vtanh.f32 %v1654_v39  ;;  %v1234_v42 = vadd.f32 %v3167_v28, %v1233_v40  ;;  %v812_v43 = vpop.f32.mrf.mxu0 }
 0x229   : > { %v2835_v44 = vpop.eup %2834  ;;  %v813_v45 = vadd.f32 %v3448_v63, %v812_v43 }
 0x22a   : > { %1358 = vst.msk [vmem:[%s3173_s21 + $0x110] sm:$0xff] %vm1323_vm2, %v1234_v42  ;;  %2544 = vmatmul.msk.f32.gmra.mxu1 %vm921_vm1, %v2835_v44  ;;  %2592 = vmatmul.msk.f32.gmra.mxu2 %vm1323_vm2, %v1234_v42  ;;  %v2073_v46 = vpop.f32.mrf.mxu3 }
 0x22b   : > { %2838 = vtanh.f32 %v813_v45  ;;  %v2074_v47 = vadd.f32 %v3495_v41, %v2073_v46 }
 0x22d   : > { %2265 = vst.msk [vmem:[%s3507_s16] sm:$0xff] %vm449_vm0, %v2074_v47  ;;  %v1656_v48 = vpop.f32.mrf.mxu2 }
 0x22e   : > { %v2837_v49 = vpop.eup %2836  ;;  %v1657_v50 = vadd.f32 %v3319_v7, %v1656_v48 }
 0x22f   : > { %v1236_v51 = vpop.f32.mrf.mxu1  ;;  %2639 = vmatmul.msk.f32.gmra.mxu3 %vm921_vm1, %v2837_v49 }
 0x230   : > { %2840 = vtanh.f32 %v1657_v50  ;;  %v1237_v52 = vadd.f32 %v3167_v28, %v1236_v51  ;;  %v815_v53 = vpop.f32.mrf.mxu0 }
 0x231   : > { %v2839_v54 = vpop.eup %2838  ;;  %v816_v55 = vadd.f32 %v3448_v63, %v815_v53 }
 0x232   : > { %1359 = vst.msk [vmem:[%s3173_s21 + $0x118] sm:$0xff] %vm1323_vm2, %v1237_v52  ;;  %2545 = vmatmul.msk.f32.gmra.mxu1 %vm921_vm1, %v2839_v54  ;;  %2593 = vmatmul.msk.f32.gmra.mxu2 %vm1323_vm2, %v1237_v52  ;;  %v2076_v56 = vpop.f32.mrf.mxu3 }
 0x233   : > { %2842 = vtanh.f32 %v816_v55  ;;  %v2077_v57 = vadd.f32 %v3495_v41, %v2076_v56 }
 0x235   : > { %2266 = vst.msk [vmem:[%s3507_s16 + $0x8] sm:$0xff] %vm449_vm0, %v2077_v57  ;;  %v1659_v58 = vpop.f32.mrf.mxu2 }
 0x236   : > { %v2841_v59 = vpop.eup %2840  ;;  %v1660_v22 = vadd.f32 %v3319_v7, %v1659_v58 }
 0x237   : > { %v1239_v60 = vpop.f32.mrf.mxu1  ;;  %2640 = vmatmul.msk.f32.gmra.mxu3 %vm921_vm1, %v2841_v59 }
 0x238   : > { %2844 = vtanh.f32 %v1660_v22  ;;  %v1240_v61 = vadd.f32 %v3167_v28, %v1239_v60  ;;  %v818_v62 = vpop.f32.mrf.mxu0 }
 0x239   : > { %v2843_v0 = vpop.eup %2842  ;;  %v819_v1 = vadd.f32 %v3448_v63, %v818_v62 }
 0x23a   : > { %1360 = vst.msk [vmem:[%s3173_s21 + $0x120] sm:$0xff] %vm1323_vm2, %v1240_v61  ;;  %2546 = vmatmul.msk.f32.gmra.mxu1 %vm921_vm1, %v2843_v0  ;;  %2594 = vmatmul.msk.f32.gmra.mxu2 %vm1323_vm2, %v1240_v61  ;;  %v2079_v2 = vpop.f32.mrf.mxu3 }
 0x23b   : > { %2846 = vtanh.f32 %v819_v1  ;;  %v2080_v3 = vadd.f32 %v3495_v41, %v2079_v2 }
 0x23d   : > { %2267 = vst.msk [vmem:[%s3507_s16 + $0x10] sm:$0xff] %vm449_vm0, %v2080_v3  ;;  %v1662_v4 = vpop.f32.mrf.mxu2 }
 0x23e   : > { %v2845_v5 = vpop.eup %2844  ;;  %v1663_v28 = vadd.f32 %v3319_v7, %v1662_v4 }
 0x23f   : > { %v1242_v6 = vpop.f32.mrf.mxu1  ;;  %2641 = vmatmul.msk.f32.gmra.mxu3 %vm921_vm1, %v2845_v5 }
 0x240   : > { %2848 = vtanh.f32 %v1663_v28  ;;  %v1243_v9 = vadd.f32 %v3539_v8, %v1242_v6  ;;  %v821_v10 = vpop.f32.mrf.mxu0 }
 0x241   : > { %v2847_v11 = vpop.eup %2846  ;;  %v822_v12 = vadd.f32 %v3448_v63, %v821_v10 }
 0x242   : > { %1361 = vst.msk [vmem:[%s3173_s21 + $0x128] sm:$0xff] %vm1323_vm2, %v1243_v9  ;;  %2547 = vmatmul.msk.f32.gmra.mxu1 %vm921_vm1, %v2847_v11  ;;  %2595 = vmatmul.msk.f32.gmra.mxu2 %vm1323_vm2, %v1243_v9  ;;  %v2082_v13 = vpop.f32.mrf.mxu3 }
 0x243   : > { %2850 = vtanh.f32 %v822_v12  ;;  %v2083_v14 = vadd.f32 %v3495_v41, %v2082_v13 }
 0x245   : > { %2268 = vst.msk [vmem:[%s3507_s16 + $0x18] sm:$0xff] %vm449_vm0, %v2083_v14  ;;  %v1665_v15 = vpop.f32.mrf.mxu2 }
 0x246   : > { %v2849_v16 = vpop.eup %2848  ;;  %v1666_v17 = vadd.f32 %v3319_v7, %v1665_v15 }
 0x247   : > { %v1245_v18 = vpop.f32.mrf.mxu1  ;;  %2642 = vmatmul.msk.f32.gmra.mxu3 %vm921_vm1, %v2849_v16 }
 0x248   : > { %2852 = vtanh.f32 %v1666_v17  ;;  %v1246_v19 = vadd.f32 %v3539_v8, %v1245_v18  ;;  %v824_v20 = vpop.f32.mrf.mxu0 }
 0x249   : > { %v2851_v21 = vpop.eup %2850  ;;  %v825_v23 = vadd.f32 %v3448_v63, %v824_v20 }
 0x24a   : > { %1362 = vst.msk [vmem:[%s3173_s21 + $0x130] sm:$0xff] %vm1323_vm2, %v1246_v19  ;;  %2548 = vmatmul.msk.f32.gmra.mxu1 %vm921_vm1, %v2851_v21  ;;  %2596 = vmatmul.msk.f32.gmra.mxu2 %vm1323_vm2, %v1246_v19  ;;  %v2085_v24 = vpop.f32.mrf.mxu3 }
 0x24b   : > { %2854 = vtanh.f32 %v825_v23  ;;  %v2086_v25 = vadd.f32 %v3495_v41, %v2085_v24 }
 0x24d   : > { %2269 = vst.msk [vmem:[%s3507_s16 + $0x20] sm:$0xff] %vm449_vm0, %v2086_v25  ;;  %v1668_v26 = vpop.f32.mrf.mxu2 }
 0x24e   : > { %v2853_v27 = vpop.eup %2852  ;;  %v1669_v29 = vadd.f32 %v3319_v7, %v1668_v26 }
 0x24f   : > { %v1248_v30 = vpop.f32.mrf.mxu1  ;;  %2643 = vmatmul.msk.f32.gmra.mxu3 %vm921_vm1, %v2853_v27 }
 0x250   : > { %2856 = vtanh.f32 %v1669_v29  ;;  %v1249_v31 = vadd.f32 %v3539_v8, %v1248_v30  ;;  %v827_v32 = vpop.f32.mrf.mxu0 }
 0x251   : > { %v2855_v33 = vpop.eup %2854  ;;  %v828_v34 = vadd.f32 %v3448_v63, %v827_v32 }
 0x252   : > { %1363 = vst.msk [vmem:[%s3173_s21 + $0x138] sm:$0xff] %vm1323_vm2, %v1249_v31  ;;  %2549 = vmatmul.msk.f32.gmra.mxu1 %vm921_vm1, %v2855_v33  ;;  %2597 = vmatmul.msk.f32.gmra.mxu2 %vm1323_vm2, %v1249_v31  ;;  %v2088_v35 = vpop.f32.mrf.mxu3 }
 0x253   : > { %2858 = vtanh.f32 %v828_v34  ;;  %v2089_v36 = vadd.f32 %v3495_v41, %v2088_v35 }
 0x255   : > { %2270 = vst.msk [vmem:[%s3507_s16 + $0x28] sm:$0xff] %vm449_vm0, %v2089_v36  ;;  %v1671_v37 = vpop.f32.mrf.mxu2 }
 0x256   : > { %v2857_v38 = vpop.eup %2856  ;;  %v1672_v39 = vadd.f32 %v3319_v7, %v1671_v37 }
 0x257   : > { %v1251_v40 = vpop.f32.mrf.mxu1  ;;  %2644 = vmatmul.msk.f32.gmra.mxu3 %vm921_vm1, %v2857_v38 }
 0x258   : > { %2860 = vtanh.f32 %v1672_v39  ;;  %v1252_v42 = vadd.f32 %v3539_v8, %v1251_v40  ;;  %v830_v43 = vpop.f32.mrf.mxu0 }
 0x259   : > { %v2859_v44 = vpop.eup %2858  ;;  %v831_v45 = vadd.f32 %v3448_v63, %v830_v43 }
 0x25a   : > { %1364 = vst.msk [vmem:[%s3173_s21 + $0x140] sm:$0xff] %vm1323_vm2, %v1252_v42  ;;  %2550 = vmatmul.msk.f32.gmra.mxu1 %vm921_vm1, %v2859_v44  ;;  %2598 = vmatmul.msk.f32.gmra.mxu2 %vm1323_vm2, %v1252_v42  ;;  %v2091_v46 = vpop.f32.mrf.mxu3 }
 0x25b   : > { %2862 = vtanh.f32 %v831_v45  ;;  %v2092_v47 = vadd.f32 %v3495_v41, %v2091_v46 }
 0x25d   : > { %2271 = vst.msk [vmem:[%s3507_s16 + $0x30] sm:$0xff] %vm449_vm0, %v2092_v47  ;;  %v1674_v48 = vpop.f32.mrf.mxu2 }
 0x25e   : > { %v2861_v49 = vpop.eup %2860  ;;  %v1675_v50 = vadd.f32 %v3319_v7, %v1674_v48 }
 0x25f   : > { %v1254_v51 = vpop.f32.mrf.mxu1  ;;  %2645 = vmatmul.msk.f32.gmra.mxu3 %vm921_vm1, %v2861_v49 }
 0x260   : > { %2864 = vtanh.f32 %v1675_v50  ;;  %v1255_v52 = vadd.f32 %v3539_v8, %v1254_v51  ;;  %v833_v53 = vpop.f32.mrf.mxu0 }
 0x261   : > { %v2863_v54 = vpop.eup %2862  ;;  %v834_v55 = vadd.f32 %v3448_v63, %v833_v53 }
 0x262   : > { %1365 = vst.msk [vmem:[%s3173_s21 + $0x148] sm:$0xff] %vm1323_vm2, %v1255_v52  ;;  %2551 = vmatmul.msk.f32.gmra.mxu1 %vm921_vm1, %v2863_v54  ;;  %2599 = vmatmul.msk.f32.gmra.mxu2 %vm1323_vm2, %v1255_v52  ;;  %v2094_v56 = vpop.f32.mrf.mxu3 }
 0x263   : > { %2866 = vtanh.f32 %v834_v55  ;;  %v2095_v57 = vadd.f32 %v3495_v41, %v2094_v56 }
 0x265   : > { %2272 = vst.msk [vmem:[%s3507_s16 + $0x38] sm:$0xff] %vm449_vm0, %v2095_v57  ;;  %v1677_v58 = vpop.f32.mrf.mxu2 }
 0x266   : > { %v2865_v59 = vpop.eup %2864  ;;  %v1678_v22 = vadd.f32 %v3319_v7, %v1677_v58 }
 0x267   : > { %v1257_v60 = vpop.f32.mrf.mxu1  ;;  %2646 = vmatmul.msk.f32.gmra.mxu3 %vm921_vm1, %v2865_v59 }
 0x268   : > { %2868 = vtanh.f32 %v1678_v22  ;;  %v1258_v61 = vadd.f32 %v3539_v8, %v1257_v60  ;;  %v836_v62 = vpop.f32.mrf.mxu0 }
 0x269   : > { %v2867_v0 = vpop.eup %2866  ;;  %v837_v1 = vadd.f32 %v3448_v63, %v836_v62 }
 0x26a   : > { %1366 = vst.msk [vmem:[%s3173_s21 + $0x150] sm:$0xff] %vm1323_vm2, %v1258_v61  ;;  %2552 = vmatmul.msk.f32.gmra.mxu1 %vm921_vm1, %v2867_v0  ;;  %2600 = vmatmul.msk.f32.gmra.mxu2 %vm1323_vm2, %v1258_v61  ;;  %v2097_v2 = vpop.f32.mrf.mxu3 }
 0x26b   : > { %2870 = vtanh.f32 %v837_v1  ;;  %v2098_v3 = vadd.f32 %v3495_v41, %v2097_v2 }
 0x26d   : > { %2273 = vst.msk [vmem:[%s3507_s16 + $0x40] sm:$0xff] %vm449_vm0, %v2098_v3  ;;  %v1680_v4 = vpop.f32.mrf.mxu2 }
 0x26e   : > { %v2869_v5 = vpop.eup %2868  ;;  %v1681_v28 = vadd.f32 %v3319_v7, %v1680_v4 }
 0x26f   : > { %v1260_v6 = vpop.f32.mrf.mxu1  ;;  %2647 = vmatmul.msk.f32.gmra.mxu3 %vm921_vm1, %v2869_v5 }
 0x270   : > { %2872 = vtanh.f32 %v1681_v28  ;;  %v1261_v9 = vadd.f32 %v3539_v8, %v1260_v6  ;;  %v839_v10 = vpop.f32.mrf.mxu0 }
 0x271   : > { %v2871_v11 = vpop.eup %2870  ;;  %v840_v12 = vadd.f32 %v3448_v63, %v839_v10 }
 0x272   : > { %1367 = vst.msk [vmem:[%s3173_s21 + $0x158] sm:$0xff] %vm1323_vm2, %v1261_v9  ;;  %2553 = vmatmul.msk.f32.gmra.mxu1 %vm921_vm1, %v2871_v11  ;;  %2601 = vmatmul.msk.f32.gmra.mxu2 %vm1323_vm2, %v1261_v9  ;;  %v2100_v13 = vpop.f32.mrf.mxu3 }
 0x273   : > { %2874 = vtanh.f32 %v840_v12  ;;  %v2101_v14 = vadd.f32 %v3495_v41, %v2100_v13 }
 0x275   : > { %2274 = vst.msk [vmem:[%s3507_s16 + $0x48] sm:$0xff] %vm449_vm0, %v2101_v14  ;;  %v1683_v15 = vpop.f32.mrf.mxu2 }
 0x276   : > { %v2873_v16 = vpop.eup %2872  ;;  %v1684_v17 = vadd.f32 %v3319_v7, %v1683_v15 }
 0x277   : > { %v1263_v18 = vpop.f32.mrf.mxu1  ;;  %2648 = vmatmul.msk.f32.gmra.mxu3 %vm921_vm1, %v2873_v16 }
 0x278   : > { %2876 = vtanh.f32 %v1684_v17  ;;  %v1264_v19 = vadd.f32 %v3539_v8, %v1263_v18  ;;  %v842_v20 = vpop.f32.mrf.mxu0 }
 0x279   : > { %v2875_v21 = vpop.eup %2874  ;;  %v843_v23 = vadd.f32 %v3448_v63, %v842_v20 }
 0x27a   : > { %1368 = vst.msk [vmem:[%s3173_s21 + $0x160] sm:$0xff] %vm1323_vm2, %v1264_v19  ;;  %2554 = vmatmul.msk.f32.gmra.mxu1 %vm921_vm1, %v2875_v21  ;;  %2602 = vmatmul.msk.f32.gmra.mxu2 %vm1323_vm2, %v1264_v19  ;;  %v2103_v24 = vpop.f32.mrf.mxu3 }
 0x27b   : > { %2878 = vtanh.f32 %v843_v23  ;;  %v2104_v25 = vadd.f32 %v3495_v41, %v2103_v24 }
 0x27d   : > { %2275 = vst.msk [vmem:[%s3507_s16 + $0x50] sm:$0xff] %vm449_vm0, %v2104_v25  ;;  %v1686_v26 = vpop.f32.mrf.mxu2 }
 0x27e   : > { %v2877_v27 = vpop.eup %2876  ;;  %v1687_v29 = vadd.f32 %v3319_v7, %v1686_v26 }
 0x27f   : > { %v1266_v30 = vpop.f32.mrf.mxu1  ;;  %2649 = vmatmul.msk.f32.gmra.mxu3 %vm921_vm1, %v2877_v27 }
 0x280   : > { %2880 = vtanh.f32 %v1687_v29  ;;  %v1267_v31 = vadd.f32 %v3539_v8, %v1266_v30  ;;  %v845_v32 = vpop.f32.mrf.mxu0 }
 0x281   : > { %v2879_v33 = vpop.eup %2878  ;;  %v846_v34 = vadd.f32 %v3448_v63, %v845_v32 }
 0x282   : > { %1369 = vst.msk [vmem:[%s3173_s21 + $0x168] sm:$0xff] %vm1323_vm2, %v1267_v31  ;;  %2555 = vmatmul.msk.f32.gmra.mxu1 %vm921_vm1, %v2879_v33  ;;  %2603 = vmatmul.msk.f32.gmra.mxu2 %vm1323_vm2, %v1267_v31  ;;  %v2106_v35 = vpop.f32.mrf.mxu3 }
 0x283   : > { %2882 = vtanh.f32 %v846_v34  ;;  %v2107_v36 = vadd.f32 %v3495_v41, %v2106_v35 }
 0x285   : > { %2276 = vst.msk [vmem:[%s3507_s16 + $0x58] sm:$0xff] %vm449_vm0, %v2107_v36  ;;  %v1689_v37 = vpop.f32.mrf.mxu2 }
 0x286   : > { %v2881_v38 = vpop.eup %2880  ;;  %v1690_v39 = vadd.f32 %v3319_v7, %v1689_v37 }
 0x287   : > { %v1269_v40 = vpop.f32.mrf.mxu1  ;;  %2650 = vmatmul.msk.f32.gmra.mxu3 %vm921_vm1, %v2881_v38 }
 0x288   : > { %2884 = vtanh.f32 %v1690_v39  ;;  %v1270_v42 = vadd.f32 %v3539_v8, %v1269_v40  ;;  %v848_v43 = vpop.f32.mrf.mxu0 }
 0x289   : > { %v2883_v44 = vpop.eup %2882  ;;  %v849_v45 = vadd.f32 %v3448_v63, %v848_v43 }
 0x28a   : > { %1370 = vst.msk [vmem:[%s3173_s21 + $0x170] sm:$0xff] %vm1323_vm2, %v1270_v42  ;;  %2556 = vmatmul.msk.f32.gmra.mxu1 %vm921_vm1, %v2883_v44  ;;  %2604 = vmatmul.msk.f32.gmra.mxu2 %vm1323_vm2, %v1270_v42  ;;  %v2109_v46 = vpop.f32.mrf.mxu3 }
 0x28b   : > { %2886 = vtanh.f32 %v849_v45  ;;  %v2110_v47 = vadd.f32 %v3495_v41, %v2109_v46 }
 0x28d   : > { %2277 = vst.msk [vmem:[%s3507_s16 + $0x60] sm:$0xff] %vm449_vm0, %v2110_v47  ;;  %v1692_v48 = vpop.f32.mrf.mxu2 }
 0x28e   : > { %v2885_v49 = vpop.eup %2884  ;;  %v1693_v50 = vadd.f32 %v3319_v7, %v1692_v48 }
 0x28f   : > { %v1272_v51 = vpop.f32.mrf.mxu1  ;;  %2651 = vmatmul.msk.f32.gmra.mxu3 %vm921_vm1, %v2885_v49 }
 0x290   : > { %2888 = vtanh.f32 %v1693_v50  ;;  %v1273_v63 = vadd.f32 %v3539_v8, %v1272_v51 }
 0x291   : > { %v2887_v52 = vpop.eup %2886 }
 0x292   : > { %1371 = vst.msk [vmem:[%s3173_s21 + $0x178] sm:$0xff] %vm1323_vm2, %v1273_v63  ;;  %2557 = vmatmul.msk.f32.gmra.mxu1 %vm921_vm1, %v2887_v52  ;;  %2605 = vmatmul.msk.f32.gmra.mxu2 %vm1323_vm2, %v1273_v63  ;;  %v2112_v53 = vpop.f32.mrf.mxu3 }
 0x293   : > { %v2113_v54 = vadd.f32 %v3495_v41, %v2112_v53 }
 0x295   : > { %2278 = vst.msk [vmem:[%s3507_s16 + $0x68] sm:$0xff] %vm449_vm0, %v2113_v54  ;;  %v1695_v55 = vpop.f32.mrf.mxu2 }
 0x296   : > { %v2889_v56 = vpop.eup %2888  ;;  %v1696_v57 = vadd.f32 %v3319_v7, %v1695_v55  ;;  %v3671_v7 = vld [vmem:[%s3959_s6] ss:$0 sm:$0xff] }
 0x297   : > { %v1275_v58 = vpop.f32.mrf.mxu1  ;;  %2652 = vmatmul.msk.f32.gmra.mxu3 %vm921_vm1, %v2889_v56 }
 0x298   : > { %2890 = vtanh.f32 %v1696_v57  ;;  %v1276_v59 = vadd.f32 %v3539_v8, %v1275_v58 }
 0x29a   : > { %1372 = vst.msk [vmem:[%s3173_s21 + $0x180] sm:$0xff] %vm1323_vm2, %v1276_v59  ;;  %2606 = vmatmul.msk.f32.gmra.mxu2 %vm1323_vm2, %v1276_v59  ;;  %v2115_v22 = vpop.f32.mrf.mxu3 }
 0x29b   : > { %v2116_v60 = vadd.f32 %v3495_v41, %v2115_v22 }
 0x29d   : > { %2279 = vst.msk [vmem:[%s3507_s16 + $0x70] sm:$0xff] %vm449_vm0, %v2116_v60  ;;  %v1698_v61 = vpop.f32.mrf.mxu2 }
 0x29e   : > { %v2891_v62 = vpop.eup %2890  ;;  %v1699_v0 = vadd.f32 %v3671_v7, %v1698_v61 }
 0x29f   : > { %v1278_v1 = vpop.f32.mrf.mxu1  ;;  %2653 = vmatmul.msk.f32.gmra.mxu3 %vm921_vm1, %v2891_v62 }
 0x2a0   : > { %2892 = vtanh.f32 %v1699_v0  ;;  %v1279_v2 = vadd.f32 %v3539_v8, %v1278_v1 }
 0x2a2   : > { %1373 = vst.msk [vmem:[%s3173_s21 + $0x188] sm:$0xff] %vm1323_vm2, %v1279_v2  ;;  %2607 = vmatmul.msk.f32.gmra.mxu2 %vm1323_vm2, %v1279_v2  ;;  %v2118_v3 = vpop.f32.mrf.mxu3 }
 0x2a3   : > { %v2119_v4 = vadd.f32 %v3495_v41, %v2118_v3 }
 0x2a5   : > { %2280 = vst.msk [vmem:[%s3507_s16 + $0x78] sm:$0xff] %vm449_vm0, %v2119_v4  ;;  %v1701_v5 = vpop.f32.mrf.mxu2 }
 0x2a6   : > { %v2893_v28 = vpop.eup %2892  ;;  %v1702_v6 = vadd.f32 %v3671_v7, %v1701_v5 }
 0x2a7   : > { %v1281_v9 = vpop.f32.mrf.mxu1  ;;  %2654 = vmatmul.msk.f32.gmra.mxu3 %vm921_vm1, %v2893_v28 }
 0x2a8   : > { %2894 = vtanh.f32 %v1702_v6  ;;  %v1282_v10 = vadd.f32 %v3539_v8, %v1281_v9 }
 0x2aa   : > { %1374 = vst.msk [vmem:[%s3173_s21 + $0x190] sm:$0xff] %vm1323_vm2, %v1282_v10  ;;  %2608 = vmatmul.msk.f32.gmra.mxu2 %vm1323_vm2, %v1282_v10  ;;  %v2121_v11 = vpop.f32.mrf.mxu3 }
 0x2ab   : > { %v2122_v12 = vadd.f32 %v3495_v41, %v2121_v11 }
 0x2ad   : > { %2281 = vst.msk [vmem:[%s3507_s16 + $0x80] sm:$0xff] %vm449_vm0, %v2122_v12  ;;  %v1704_v13 = vpop.f32.mrf.mxu2 }
 0x2ae   : > { %v2895_v14 = vpop.eup %2894  ;;  %v1705_v15 = vadd.f32 %v3671_v7, %v1704_v13 }
 0x2af   : > { %v1284_v16 = vpop.f32.mrf.mxu1  ;;  %2655 = vmatmul.msk.f32.gmra.mxu3 %vm921_vm1, %v2895_v14 }
 0x2b0   : > { %2896 = vtanh.f32 %v1705_v15  ;;  %v1285_v17 = vadd.f32 %v3539_v8, %v1284_v16 }
 0x2b2   : > { %1375 = vst.msk [vmem:[%s3173_s21 + $0x198] sm:$0xff] %vm1323_vm2, %v1285_v17  ;;  %2609 = vmatmul.msk.f32.gmra.mxu2 %vm1323_vm2, %v1285_v17  ;;  %v2124_v18 = vpop.f32.mrf.mxu3 }
 0x2b3   : > { %v2125_v19 = vadd.f32 %v3495_v41, %v2124_v18 }
 0x2b5   : > { %2282 = vst.msk [vmem:[%s3507_s16 + $0x88] sm:$0xff] %vm449_vm0, %v2125_v19  ;;  %v1707_v20 = vpop.f32.mrf.mxu2 }
 0x2b6   : > { %v2897_v21 = vpop.eup %2896  ;;  %v1708_v23 = vadd.f32 %v3671_v7, %v1707_v20 }
 0x2b7   : > { %v1287_v24 = vpop.f32.mrf.mxu1  ;;  %2656 = vmatmul.msk.f32.gmra.mxu3 %vm921_vm1, %v2897_v21 }
 0x2b8   : > { %2898 = vtanh.f32 %v1708_v23  ;;  %v1288_v25 = vadd.f32 %v3539_v8, %v1287_v24 }
 0x2ba   : > { %1376 = vst.msk [vmem:[%s3173_s21 + $0x1a0] sm:$0xff] %vm1323_vm2, %v1288_v25  ;;  %2610 = vmatmul.msk.f32.gmra.mxu2 %vm1323_vm2, %v1288_v25  ;;  %v2127_v26 = vpop.f32.mrf.mxu3 }
 0x2bb   : > { %v2128_v27 = vadd.f32 %v3495_v41, %v2127_v26 }
 0x2bd   : > { %2283 = vst.msk [vmem:[%s3507_s16 + $0x90] sm:$0xff] %vm449_vm0, %v2128_v27  ;;  %v1710_v29 = vpop.f32.mrf.mxu2 }
 0x2be   : > { %v2899_v30 = vpop.eup %2898  ;;  %v1711_v31 = vadd.f32 %v3671_v7, %v1710_v29 }
 0x2bf   : > { %v1290_v32 = vpop.f32.mrf.mxu1  ;;  %2657 = vmatmul.msk.f32.gmra.mxu3 %vm921_vm1, %v2899_v30 }
 0x2c0   : > { %2900 = vtanh.f32 %v1711_v31  ;;  %v1291_v33 = vadd.f32 %v3539_v8, %v1290_v32 }
 0x2c2   : > { %1377 = vst.msk [vmem:[%s3173_s21 + $0x1a8] sm:$0xff] %vm1323_vm2, %v1291_v33  ;;  %2611 = vmatmul.msk.f32.gmra.mxu2 %vm1323_vm2, %v1291_v33  ;;  %v2130_v34 = vpop.f32.mrf.mxu3 }
 0x2c3   : > { %v2131_v35 = vadd.f32 %v3495_v41, %v2130_v34 }
 0x2c5   : > { %2284 = vst.msk [vmem:[%s3507_s16 + $0x98] sm:$0xff] %vm449_vm0, %v2131_v35  ;;  %v1713_v36 = vpop.f32.mrf.mxu2 }
 0x2c6   : > { %v2901_v37 = vpop.eup %2900  ;;  %v1714_v38 = vadd.f32 %v3671_v7, %v1713_v36 }
 0x2c7   : > { %v1293_v39 = vpop.f32.mrf.mxu1  ;;  %2658 = vmatmul.msk.f32.gmra.mxu3 %vm921_vm1, %v2901_v37 }
 0x2c8   : > { %2902 = vtanh.f32 %v1714_v38  ;;  %v1294_v40 = vadd.f32 %v3539_v8, %v1293_v39 }
 0x2ca   : > { %1378 = vst.msk [vmem:[%s3173_s21 + $0x1b0] sm:$0xff] %vm1323_vm2, %v1294_v40  ;;  %2612 = vmatmul.msk.f32.gmra.mxu2 %vm1323_vm2, %v1294_v40  ;;  %v2133_v42 = vpop.f32.mrf.mxu3 }
 0x2cb   : > { %v2134_v43 = vadd.f32 %v3495_v41, %v2133_v42 }
 0x2cd   : > { %2285 = vst.msk [vmem:[%s3507_s16 + $0xa0] sm:$0xff] %vm449_vm0, %v2134_v43  ;;  %v1716_v44 = vpop.f32.mrf.mxu2 }
 0x2ce   : > { %v2903_v45 = vpop.eup %2902  ;;  %v1717_v46 = vadd.f32 %v3671_v7, %v1716_v44 }
 0x2cf   : > { %v1296_v47 = vpop.f32.mrf.mxu1  ;;  %2659 = vmatmul.msk.f32.gmra.mxu3 %vm921_vm1, %v2903_v45 }
 0x2d0   : > { %2904 = vtanh.f32 %v1717_v46  ;;  %v1297_v48 = vadd.f32 %v3539_v8, %v1296_v47 }
 0x2d2   : > { %1379 = vst.msk [vmem:[%s3173_s21 + $0x1b8] sm:$0xff] %vm1323_vm2, %v1297_v48  ;;  %2613 = vmatmul.msk.f32.gmra.mxu2 %vm1323_vm2, %v1297_v48  ;;  %v2136_v49 = vpop.f32.mrf.mxu3 }
 0x2d3   : > { %v2137_v50 = vadd.f32 %v3495_v41, %v2136_v49 }
 0x2d5   : > { %2286 = vst.msk [vmem:[%s3507_s16 + $0xa8] sm:$0xff] %vm449_vm0, %v2137_v50  ;;  %v1719_v51 = vpop.f32.mrf.mxu2 }
 0x2d6   : > { %v2905_v63 = vpop.eup %2904  ;;  %v1720_v52 = vadd.f32 %v3671_v7, %v1719_v51 }
 0x2d7   : > { %v1299_v53 = vpop.f32.mrf.mxu1  ;;  %2660 = vmatmul.msk.f32.gmra.mxu3 %vm921_vm1, %v2905_v63 }
 0x2d8   : > { %2906 = vtanh.f32 %v1720_v52  ;;  %v1300_v54 = vadd.f32 %v3539_v8, %v1299_v53 }
 0x2da   : > { %1380 = vst.msk [vmem:[%s3173_s21 + $0x1c0] sm:$0xff] %vm1323_vm2, %v1300_v54  ;;  %2614 = vmatmul.msk.f32.gmra.mxu2 %vm1323_vm2, %v1300_v54  ;;  %v2139_v55 = vpop.f32.mrf.mxu3 }
 0x2db   : > { %v2140_v56 = vadd.f32 %v3495_v41, %v2139_v55 }
 0x2dd   : > { %2287 = vst.msk [vmem:[%s3507_s16 + $0xb0] sm:$0xff] %vm449_vm0, %v2140_v56  ;;  %v1722_v57 = vpop.f32.mrf.mxu2 }
 0x2de   : > { %v2907_v58 = vpop.eup %2906  ;;  %v1723_v59 = vadd.f32 %v3671_v7, %v1722_v57 }
 0x2df   : > { %v1302_v22 = vpop.f32.mrf.mxu1  ;;  %2661 = vmatmul.msk.f32.gmra.mxu3 %vm921_vm1, %v2907_v58 }
 0x2e0   : > { %2908 = vtanh.f32 %v1723_v59  ;;  %v1303_v60 = vadd.f32 %v3539_v8, %v1302_v22 }
 0x2e2   : > { %1381 = vst.msk [vmem:[%s3173_s21 + $0x1c8] sm:$0xff] %vm1323_vm2, %v1303_v60  ;;  %2615 = vmatmul.msk.f32.gmra.mxu2 %vm1323_vm2, %v1303_v60  ;;  %v2142_v61 = vpop.f32.mrf.mxu3 }
 0x2e3   : > { %v2143_v62 = vadd.f32 %v3495_v41, %v2142_v61 }
 0x2e5   : > { %2288 = vst.msk [vmem:[%s3507_s16 + $0xb8] sm:$0xff] %vm449_vm0, %v2143_v62  ;;  %v1725_v0 = vpop.f32.mrf.mxu2 }
 0x2e6   : > { %v2909_v1 = vpop.eup %2908  ;;  %v1726_v2 = vadd.f32 %v3671_v7, %v1725_v0 }
 0x2e7   : > { %v1305_v3 = vpop.f32.mrf.mxu1  ;;  %2662 = vmatmul.msk.f32.gmra.mxu3 %vm921_vm1, %v2909_v1 }
 0x2e8   : > { %2910 = vtanh.f32 %v1726_v2  ;;  %v1306_v4 = vadd.f32 %v3539_v8, %v1305_v3 }
 0x2ea   : > { %1382 = vst.msk [vmem:[%s3173_s21 + $0x1d0] sm:$0xff] %vm1323_vm2, %v1306_v4  ;;  %2616 = vmatmul.msk.f32.gmra.mxu2 %vm1323_vm2, %v1306_v4  ;;  %v2145_v5 = vpop.f32.mrf.mxu3 }
 0x2eb   : > { %v2146_v28 = vadd.f32 %v3495_v41, %v2145_v5 }
 0x2ed   : > { %2289 = vst.msk [vmem:[%s3507_s16 + $0xc0] sm:$0xff] %vm449_vm0, %v2146_v28  ;;  %v1728_v6 = vpop.f32.mrf.mxu2 }
 0x2ee   : > { %v2911_v9 = vpop.eup %2910  ;;  %v1729_v10 = vadd.f32 %v3671_v7, %v1728_v6 }
 0x2ef   : > { %v1308_v11 = vpop.f32.mrf.mxu1  ;;  %2663 = vmatmul.msk.f32.gmra.mxu3 %vm921_vm1, %v2911_v9 }
 0x2f0   : > { %2912 = vtanh.f32 %v1729_v10  ;;  %v1309_v12 = vadd.f32 %v3539_v8, %v1308_v11 }
 0x2f2   : > { %1383 = vst.msk [vmem:[%s3173_s21 + $0x1d8] sm:$0xff] %vm1323_vm2, %v1309_v12  ;;  %2617 = vmatmul.msk.f32.gmra.mxu2 %vm1323_vm2, %v1309_v12  ;;  %v2148_v13 = vpop.f32.mrf.mxu3 }
 0x2f3   : > { %v2149_v14 = vadd.f32 %v3495_v41, %v2148_v13 }
 0x2f5   : > { %2290 = vst.msk [vmem:[%s3507_s16 + $0xc8] sm:$0xff] %vm449_vm0, %v2149_v14  ;;  %v1731_v15 = vpop.f32.mrf.mxu2 }
 0x2f6   : > { %v2913_v16 = vpop.eup %2912  ;;  %v1732_v17 = vadd.f32 %v3671_v7, %v1731_v15 }
 0x2f7   : > { %v1311_v18 = vpop.f32.mrf.mxu1  ;;  %2664 = vmatmul.msk.f32.gmra.mxu3 %vm921_vm1, %v2913_v16 }
 0x2f8   : > { %2914 = vtanh.f32 %v1732_v17  ;;  %v1312_v19 = vadd.f32 %v3539_v8, %v1311_v18 }
 0x2fa   : > { %1384 = vst.msk [vmem:[%s3173_s21 + $0x1e0] sm:$0xff] %vm1323_vm2, %v1312_v19  ;;  %2618 = vmatmul.msk.f32.gmra.mxu2 %vm1323_vm2, %v1312_v19  ;;  %v2151_v20 = vpop.f32.mrf.mxu3 }
 0x2fb   : > { %v2152_v21 = vadd.f32 %v3495_v41, %v2151_v20 }
 0x2fd   : > { %2291 = vst.msk [vmem:[%s3507_s16 + $0xd0] sm:$0xff] %vm449_vm0, %v2152_v21  ;;  %v1734_v23 = vpop.f32.mrf.mxu2 }
 0x2fe   : > { %v2915_v24 = vpop.eup %2914  ;;  %v1735_v25 = vadd.f32 %v3671_v7, %v1734_v23 }
 0x2ff   : > { %v1314_v26 = vpop.f32.mrf.mxu1  ;;  %2665 = vmatmul.msk.f32.gmra.mxu3 %vm921_vm1, %v2915_v24 }
 0x300   : > { %2916 = vtanh.f32 %v1735_v25  ;;  %v1315_v27 = vadd.f32 %v3539_v8, %v1314_v26 }
 0x302   : > { %1385 = vst.msk [vmem:[%s3173_s21 + $0x1e8] sm:$0xff] %vm1323_vm2, %v1315_v27  ;;  %2619 = vmatmul.msk.f32.gmra.mxu2 %vm1323_vm2, %v1315_v27  ;;  %v2154_v29 = vpop.f32.mrf.mxu3 }
 0x303   : > { %v2155_v30 = vadd.f32 %v3495_v41, %v2154_v29 }
 0x305   : > { %2292 = vst.msk [vmem:[%s3507_s16 + $0xd8] sm:$0xff] %vm449_vm0, %v2155_v30  ;;  %v1737_v31 = vpop.f32.mrf.mxu2 }
 0x306   : > { %v2917_v32 = vpop.eup %2916  ;;  %v1738_v33 = vadd.f32 %v3671_v7, %v1737_v31 }
 0x307   : > { %v1317_v34 = vpop.f32.mrf.mxu1  ;;  %2666 = vmatmul.msk.f32.gmra.mxu3 %vm921_vm1, %v2917_v32 }
 0x308   : > { %2918 = vtanh.f32 %v1738_v33  ;;  %v1318_v35 = vadd.f32 %v3539_v8, %v1317_v34 }
 0x30a   : > { %1386 = vst.msk [vmem:[%s3173_s21 + $0x1f0] sm:$0xff] %vm1323_vm2, %v1318_v35  ;;  %2620 = vmatmul.msk.f32.gmra.mxu2 %vm1323_vm2, %v1318_v35  ;;  %v2157_v36 = vpop.f32.mrf.mxu3 }
 0x30b   : > { %v2158_v37 = vadd.f32 %v3495_v41, %v2157_v36 }
 0x30d   : > { %2293 = vst.msk [vmem:[%s3507_s16 + $0xe0] sm:$0xff] %vm449_vm0, %v2158_v37  ;;  %v1740_v38 = vpop.f32.mrf.mxu2 }
 0x30e   : > { %v2919_v39 = vpop.eup %2918  ;;  %v1741_v40 = vadd.f32 %v3671_v7, %v1740_v38 }
 0x30f   : > { %v1320_v42 = vpop.f32.mrf.mxu1  ;;  %2667 = vmatmul.msk.f32.gmra.mxu3 %vm921_vm1, %v2919_v39 }
 0x310   : > { %2920 = vtanh.f32 %v1741_v40  ;;  %v1321_v43 = vadd.f32 %v3539_v8, %v1320_v42 }
 0x312   : > { %1387 = vst.msk [vmem:[%s3173_s21 + $0x1f8] sm:$0xff] %vm1323_vm2, %v1321_v43  ;;  %2621 = vmatmul.msk.f32.gmra.mxu2 %vm1323_vm2, %v1321_v43  ;;  %v2160_v44 = vpop.f32.mrf.mxu3  ;;  %v3868_v43 = vld [vmem:[%s3961_s8] ss:$0 sm:$0xff] }
 0x313   : > { %v2161_v45 = vadd.f32 %v3495_v41, %v2160_v44 }
 0x315   : > { %2294 = vst.msk [vmem:[%s3507_s16 + $0xe8] sm:$0xff] %vm449_vm0, %v2161_v45  ;;  %v1743_v46 = vpop.f32.mrf.mxu2 }
 0x316   : > { %v2921_v47 = vpop.eup %2920  ;;  %v1744_v48 = vadd.f32 %v3671_v7, %v1743_v46 }
 0x317   : > { %2668 = vmatmul.msk.f32.gmra.mxu3 %vm921_vm1, %v2921_v47 }
 0x318   : > { %2922 = vtanh.f32 %v1744_v48 }
 0x31a   : > { %v2163_v49 = vpop.f32.mrf.mxu3 }
 0x31b   : > { %v2164_v8 = vadd.f32 %v3495_v41, %v2163_v49 }
 0x31d   : > { %2295 = vst.msk [vmem:[%s3507_s16 + $0xf0] sm:$0xff] %vm449_vm0, %v2164_v8  ;;  %v1746_v50 = vpop.f32.mrf.mxu2 }
 0x31e   : > { %v2923_v51 = vpop.eup %2922  ;;  %v1747_v63 = vadd.f32 %v3671_v7, %v1746_v50 }
 0x31f   : > { %2669 = vmatmul.msk.f32.gmra.mxu3 %vm921_vm1, %v2923_v51 }
 0x320   : > { %2924 = vtanh.f32 %v1747_v63 }
 0x322   : > { %v2166_v52 = vpop.f32.mrf.mxu3 }
 0x323   : > { %v2167_v53 = vadd.f32 %v3495_v41, %v2166_v52 }
 0x325   : > { %2296 = vst.msk [vmem:[%s3507_s16 + $0xf8] sm:$0xff] %vm449_vm0, %v2167_v53  ;;  %v1749_v54 = vpop.f32.mrf.mxu2 }
 0x326   : > { %v2925_v55 = vpop.eup %2924  ;;  %v1750_v56 = vadd.f32 %v3671_v7, %v1749_v54 }
 0x327   : > { %2670 = vmatmul.msk.f32.gmra.mxu3 %vm921_vm1, %v2925_v55 }
 0x328   : > { %2926 = vtanh.f32 %v1750_v56 }
 0x32a   : > { %v2169_v57 = vpop.f32.mrf.mxu3 }
 0x32b   : > { %v2170_v58 = vadd.f32 %v3495_v41, %v2169_v57 }
 0x32d   : > { %2297 = vst.msk [vmem:[%s3507_s16 + $0x100] sm:$0xff] %vm449_vm0, %v2170_v58  ;;  %v1752_v59 = vpop.f32.mrf.mxu2 }
 0x32e   : > { %v2927_v22 = vpop.eup %2926  ;;  %v1753_v60 = vadd.f32 %v3671_v7, %v1752_v59 }
 0x32f   : > { %2671 = vmatmul.msk.f32.gmra.mxu3 %vm921_vm1, %v2927_v22 }
 0x330   : > { %2928 = vtanh.f32 %v1753_v60 }
 0x332   : > { %v2172_v61 = vpop.f32.mrf.mxu3 }
 0x333   : > { %v2173_v62 = vadd.f32 %v3495_v41, %v2172_v61 }
 0x335   : > { %2298 = vst.msk [vmem:[%s3507_s16 + $0x108] sm:$0xff] %vm449_vm0, %v2173_v62  ;;  %v1755_v0 = vpop.f32.mrf.mxu2 }
 0x336   : > { %v2929_v1 = vpop.eup %2928  ;;  %v1756_v2 = vadd.f32 %v3671_v7, %v1755_v0 }
 0x337   : > { %2672 = vmatmul.msk.f32.gmra.mxu3 %vm921_vm1, %v2929_v1 }
 0x338   : > { %2930 = vtanh.f32 %v1756_v2 }
 0x33a   : > { %v2175_v3 = vpop.f32.mrf.mxu3 }
 0x33b   : > { %v2176_v4 = vadd.f32 %v3495_v41, %v2175_v3 }
 0x33d   : > { %2299 = vst.msk [vmem:[%s3507_s16 + $0x110] sm:$0xff] %vm449_vm0, %v2176_v4  ;;  %v1758_v5 = vpop.f32.mrf.mxu2 }
 0x33e   : > { %v2931_v28 = vpop.eup %2930  ;;  %v1759_v6 = vadd.f32 %v3671_v7, %v1758_v5 }
 0x33f   : > { %2673 = vmatmul.msk.f32.gmra.mxu3 %vm921_vm1, %v2931_v28 }
 0x340   : > { %2932 = vtanh.f32 %v1759_v6 }
 0x342   : > { %v2178_v9 = vpop.f32.mrf.mxu3 }
 0x343   : > { %v2179_v10 = vadd.f32 %v3495_v41, %v2178_v9 }
 0x345   : > { %2300 = vst.msk [vmem:[%s3507_s16 + $0x118] sm:$0xff] %vm449_vm0, %v2179_v10  ;;  %v1761_v11 = vpop.f32.mrf.mxu2 }
 0x346   : > { %v2933_v12 = vpop.eup %2932  ;;  %v1762_v13 = vadd.f32 %v3671_v7, %v1761_v11 }
 0x347   : > { %2674 = vmatmul.msk.f32.gmra.mxu3 %vm921_vm1, %v2933_v12 }
 0x348   : > { %2934 = vtanh.f32 %v1762_v13 }
 0x34a   : > { %v2181_v14 = vpop.f32.mrf.mxu3 }
 0x34b   : > { %v2182_v15 = vadd.f32 %v3495_v41, %v2181_v14 }
 0x34d   : > { %2301 = vst.msk [vmem:[%s3507_s16 + $0x120] sm:$0xff] %vm449_vm0, %v2182_v15  ;;  %v1764_v16 = vpop.f32.mrf.mxu2 }
 0x34e   : > { %v2935_v17 = vpop.eup %2934  ;;  %v1765_v18 = vadd.f32 %v3671_v7, %v1764_v16 }
 0x34f   : > { %2675 = vmatmul.msk.f32.gmra.mxu3 %vm921_vm1, %v2935_v17 }
 0x350   : > { %2936 = vtanh.f32 %v1765_v18 }
 0x352   : > { %v2184_v19 = vpop.f32.mrf.mxu3 }
 0x353   : > { %v2185_v20 = vadd.f32 %v3495_v41, %v2184_v19 }
 0x355   : > { %2302 = vst.msk [vmem:[%s3507_s16 + $0x128] sm:$0xff] %vm449_vm0, %v2185_v20  ;;  %v1767_v21 = vpop.f32.mrf.mxu2 }
 0x356   : > { %v2937_v23 = vpop.eup %2936  ;;  %v1768_v24 = vadd.f32 %v3671_v7, %v1767_v21 }
 0x357   : > { %2676 = vmatmul.msk.f32.gmra.mxu3 %vm921_vm1, %v2937_v23 }
 0x358   : > { %2938 = vtanh.f32 %v1768_v24 }
 0x35a   : > { %v2187_v25 = vpop.f32.mrf.mxu3 }
 0x35b   : > { %v2188_v26 = vadd.f32 %v3495_v41, %v2187_v25 }
 0x35d   : > { %2303 = vst.msk [vmem:[%s3507_s16 + $0x130] sm:$0xff] %vm449_vm0, %v2188_v26  ;;  %v1770_v27 = vpop.f32.mrf.mxu2 }
 0x35e   : > { %v2939_v29 = vpop.eup %2938  ;;  %v1771_v30 = vadd.f32 %v3671_v7, %v1770_v27 }
 0x35f   : > { %2677 = vmatmul.msk.f32.gmra.mxu3 %vm921_vm1, %v2939_v29 }
 0x360   : > { %2940 = vtanh.f32 %v1771_v30 }
 0x362   : > { %v2190_v31 = vpop.f32.mrf.mxu3 }
 0x363   : > { %v2191_v32 = vadd.f32 %v3495_v41, %v2190_v31 }
 0x365   : > { %2304 = vst.msk [vmem:[%s3507_s16 + $0x138] sm:$0xff] %vm449_vm0, %v2191_v32  ;;  %v1773_v33 = vpop.f32.mrf.mxu2 }
 0x366   : > { %v2941_v34 = vpop.eup %2940  ;;  %v1774_v35 = vadd.f32 %v3671_v7, %v1773_v33 }
 0x367   : > { %2678 = vmatmul.msk.f32.gmra.mxu3 %vm921_vm1, %v2941_v34 }
 0x368   : > { %2942 = vtanh.f32 %v1774_v35 }
 0x36a   : > { %v2193_v36 = vpop.f32.mrf.mxu3 }
 0x36b   : > { %v2194_v37 = vadd.f32 %v3495_v41, %v2193_v36 }
 0x36d   : > { %2305 = vst.msk [vmem:[%s3507_s16 + $0x140] sm:$0xff] %vm449_vm0, %v2194_v37  ;;  %v1776_v38 = vpop.f32.mrf.mxu2 }
 0x36e   : > { %v2943_v39 = vpop.eup %2942  ;;  %v1777_v40 = vadd.f32 %v3671_v7, %v1776_v38 }
 0x36f   : > { %2679 = vmatmul.msk.f32.gmra.mxu3 %vm921_vm1, %v2943_v39 }
 0x370   : > { %2944 = vtanh.f32 %v1777_v40 }
 0x372   : > { %v2196_v42 = vpop.f32.mrf.mxu3 }
 0x373   : > { %v2197_v44 = vadd.f32 %v3868_v43, %v2196_v42 }
 0x375   : > { %2306 = vst.msk [vmem:[%s3507_s16 + $0x148] sm:$0xff] %vm449_vm0, %v2197_v44  ;;  %v1779_v41 = vpop.f32.mrf.mxu2 }
 0x376   : > { %v2945_v45 = vpop.eup %2944  ;;  %v1780_v46 = vadd.f32 %v3671_v7, %v1779_v41 }
 0x377   : > { %2680 = vmatmul.msk.f32.gmra.mxu3 %vm921_vm1, %v2945_v45 }
 0x378   : > { %2946 = vtanh.f32 %v1780_v46 }
 0x37a   : > { %v2199_v47 = vpop.f32.mrf.mxu3 }
 0x37b   : > { %v2200_v48 = vadd.f32 %v3868_v43, %v2199_v47 }
 0x37d   : > { %2307 = vst.msk [vmem:[%s3507_s16 + $0x150] sm:$0xff] %vm449_vm0, %v2200_v48  ;;  %v1782_v49 = vpop.f32.mrf.mxu2 }
 0x37e   : > { %v2947_v8 = vpop.eup %2946  ;;  %v1783_v50 = vadd.f32 %v3671_v7, %v1782_v49 }
 0x37f   : > { %2681 = vmatmul.msk.f32.gmra.mxu3 %vm921_vm1, %v2947_v8 }
 0x380   : > { %2948 = vtanh.f32 %v1783_v50 }
 0x382   : > { %v2202_v51 = vpop.f32.mrf.mxu3 }
 0x383   : > { %v2203_v63 = vadd.f32 %v3868_v43, %v2202_v51 }
 0x385   : > { %2308 = vst.msk [vmem:[%s3507_s16 + $0x158] sm:$0xff] %vm449_vm0, %v2203_v63  ;;  %v1785_v52 = vpop.f32.mrf.mxu2 }
 0x386   : > { %v2949_v53 = vpop.eup %2948  ;;  %v1786_v54 = vadd.f32 %v3671_v7, %v1785_v52 }
 0x387   : > { %2682 = vmatmul.msk.f32.gmra.mxu3 %vm921_vm1, %v2949_v53 }
 0x388   : > { %2950 = vtanh.f32 %v1786_v54 }
 0x38a   : > { %v2205_v55 = vpop.f32.mrf.mxu3 }
 0x38b   : > { %v2206_v56 = vadd.f32 %v3868_v43, %v2205_v55 }
 0x38d   : > { %2309 = vst.msk [vmem:[%s3507_s16 + $0x160] sm:$0xff] %vm449_vm0, %v2206_v56  ;;  %v1788_v57 = vpop.f32.mrf.mxu2 }
 0x38e   : > { %v2951_v58 = vpop.eup %2950  ;;  %v1789_v59 = vadd.f32 %v3671_v7, %v1788_v57 }
 0x38f   : > { %2683 = vmatmul.msk.f32.gmra.mxu3 %vm921_vm1, %v2951_v58 }
 0x390   : > { %2952 = vtanh.f32 %v1789_v59 }
 0x392   : > { %v2208_v22 = vpop.f32.mrf.mxu3 }
 0x393   : > { %v2209_v60 = vadd.f32 %v3868_v43, %v2208_v22 }
 0x395   : > { %2310 = vst.msk [vmem:[%s3507_s16 + $0x168] sm:$0xff] %vm449_vm0, %v2209_v60  ;;  %v1791_v61 = vpop.f32.mrf.mxu2 }
 0x396   : > { %v2953_v62 = vpop.eup %2952  ;;  %v1792_v0 = vadd.f32 %v3671_v7, %v1791_v61 }
 0x397   : > { %2684 = vmatmul.msk.f32.gmra.mxu3 %vm921_vm1, %v2953_v62 }
 0x398   : > { %2954 = vtanh.f32 %v1792_v0 }
 0x39a   : > { %v2211_v1 = vpop.f32.mrf.mxu3 }
 0x39b   : > { %v2212_v2 = vadd.f32 %v3868_v43, %v2211_v1 }
 0x39d   : > { %2311 = vst.msk [vmem:[%s3507_s16 + $0x170] sm:$0xff] %vm449_vm0, %v2212_v2 }
 0x39e   : > { %v2955_v3 = vpop.eup %2954 }
 0x39f   : > { %2685 = vmatmul.msk.f32.gmra.mxu3 %vm921_vm1, %v2955_v3 }
 0x3a2   : > { %v2214_v4 = vpop.f32.mrf.mxu3 }
 0x3a3   : > { %v2215_v5 = vadd.f32 %v3868_v43, %v2214_v4 }
 0x3a5   : > { %2312 = vst.msk [vmem:[%s3507_s16 + $0x178] sm:$0xff] %vm449_vm0, %v2215_v5 }
 0x3aa   : > { %v2217_v7 = vpop.f32.mrf.mxu3 }
 0x3ab   : > { %v2218_v28 = vadd.f32 %v3868_v43, %v2217_v7 }
 0x3ad   : > { %2313 = vst.msk [vmem:[%s3507_s16 + $0x180] sm:$0xff] %vm449_vm0, %v2218_v28 }
 0x3b2   : > { %v2220_v6 = vpop.f32.mrf.mxu3 }
 0x3b3   : > { %v2221_v9 = vadd.f32 %v3868_v43, %v2220_v6 }
 0x3b5   : > { %2314 = vst.msk [vmem:[%s3507_s16 + $0x188] sm:$0xff] %vm449_vm0, %v2221_v9 }
 0x3ba   : > { %v2223_v10 = vpop.f32.mrf.mxu3 }
 0x3bb   : > { %v2224_v11 = vadd.f32 %v3868_v43, %v2223_v10 }
 0x3bd   : > { %2315 = vst.msk [vmem:[%s3507_s16 + $0x190] sm:$0xff] %vm449_vm0, %v2224_v11 }
 0x3c2   : > { %v2226_v12 = vpop.f32.mrf.mxu3 }
 0x3c3   : > { %v2227_v13 = vadd.f32 %v3868_v43, %v2226_v12 }
 0x3c5   : > { %2316 = vst.msk [vmem:[%s3507_s16 + $0x198] sm:$0xff] %vm449_vm0, %v2227_v13 }
 0x3ca   : > { %v2229_v14 = vpop.f32.mrf.mxu3 }
 0x3cb   : > { %v2230_v15 = vadd.f32 %v3868_v43, %v2229_v14 }
 0x3cd   : > { %2317 = vst.msk [vmem:[%s3507_s16 + $0x1a0] sm:$0xff] %vm449_vm0, %v2230_v15 }
 0x3d2   : > { %v2232_v16 = vpop.f32.mrf.mxu3 }
 0x3d3   : > { %v2233_v17 = vadd.f32 %v3868_v43, %v2232_v16 }
 0x3d5   : > { %2318 = vst.msk [vmem:[%s3507_s16 + $0x1a8] sm:$0xff] %vm449_vm0, %v2233_v17 }
 0x3da   : > { %v2235_v18 = vpop.f32.mrf.mxu3 }
 0x3db   : > { %v2236_v19 = vadd.f32 %v3868_v43, %v2235_v18 }
 0x3dd   : > { %2319 = vst.msk [vmem:[%s3507_s16 + $0x1b0] sm:$0xff] %vm449_vm0, %v2236_v19 }
 0x3e2   : > { %v2238_v20 = vpop.f32.mrf.mxu3 }
 0x3e3   : > { %v2239_v21 = vadd.f32 %v3868_v43, %v2238_v20 }
 0x3e5   : > { %2320 = vst.msk [vmem:[%s3507_s16 + $0x1b8] sm:$0xff] %vm449_vm0, %v2239_v21 }
 0x3ea   : > { %v2241_v23 = vpop.f32.mrf.mxu3 }
 0x3eb   : > { %v2242_v24 = vadd.f32 %v3868_v43, %v2241_v23 }
 0x3ed   : > { %2321 = vst.msk [vmem:[%s3507_s16 + $0x1c0] sm:$0xff] %vm449_vm0, %v2242_v24 }
 0x3f2   : > { %v2244_v25 = vpop.f32.mrf.mxu3 }
 0x3f3   : > { %v2245_v26 = vadd.f32 %v3868_v43, %v2244_v25 }
 0x3f5   : > { %2322 = vst.msk [vmem:[%s3507_s16 + $0x1c8] sm:$0xff] %vm449_vm0, %v2245_v26 }
 0x3fa   : > { %v2247_v27 = vpop.f32.mrf.mxu3 }
 0x3fb   : > { %v2248_v29 = vadd.f32 %v3868_v43, %v2247_v27 }
 0x3fd   : > { %2323 = vst.msk [vmem:[%s3507_s16 + $0x1d0] sm:$0xff] %vm449_vm0, %v2248_v29 }
 0x402   : > { %v2250_v30 = vpop.f32.mrf.mxu3 }
 0x403   : > { %v2251_v31 = vadd.f32 %v3868_v43, %v2250_v30 }
 0x405   : > { %2324 = vst.msk [vmem:[%s3507_s16 + $0x1d8] sm:$0xff] %vm449_vm0, %v2251_v31 }
 0x40a   : > { %v2253_v32 = vpop.f32.mrf.mxu3 }
 0x40b   : > { %v2254_v33 = vadd.f32 %v3868_v43, %v2253_v32 }
 0x40d   : > { %2325 = vst.msk [vmem:[%s3507_s16 + $0x1e0] sm:$0xff] %vm449_vm0, %v2254_v33 }
 0x412   : > { %v2256_v34 = vpop.f32.mrf.mxu3 }
 0x413   : > { %v2257_v35 = vadd.f32 %v3868_v43, %v2256_v34 }
 0x415   : > { %2326 = vst.msk [vmem:[%s3507_s16 + $0x1e8] sm:$0xff] %vm449_vm0, %v2257_v35 }
 0x41a   : > { %v2259_v36 = vpop.f32.mrf.mxu3 }
 0x41b   : > { %v2260_v37 = vadd.f32 %v3868_v43, %v2259_v36 }
 0x41d   : > { %2327 = vst.msk [vmem:[%s3507_s16 + $0x1f0] sm:$0xff] %vm449_vm0, %v2260_v37 }
 0x422   : > { %v2262_v38 = vpop.f32.mrf.mxu3 }
 0x423   : > { %v2263_v39 = vadd.f32 %v3868_v43, %v2262_v38 }
 0x425   : > { %2328 = vst.msk [vmem:[%s3507_s16 + $0x1f8] sm:$0xff] %vm449_vm0, %v2263_v39 }
 0x426 PF: > { %s21_s13 = sadd.s32 1, %s2966_s13  }
 0x427   : > { %p18_p4 = scmp.ge.s32.totalorder %s21_s13, 4  }
 0x429   :  { %20 = sbr.rel (!%p18_p4) target bundleno = 1 (0x1), region = 98 }

</bundles_post_ra>
